<compile_context>
chip_gen: v7x
topology: tpu7x:2x2x1
jax: 0.10.0
libtpu: 0.0.40
codegen_flags: <defaults>
</compile_context>

<pallas_src>
import math
import functools

import jax
import jax.numpy as jnp
from jax.experimental import pallas as pl
from jax.experimental.pallas import tpu as pltpu

LANE = 128  # TPU lane width; padded feature width used inside the kernels.


# ----------------------------- kernel helpers -------------------------------

def _masked_layernorm_relu(x, gamma, beta, f_real, eps=1e-5):
    """LayerNorm over the first `f_real` lanes of a zero-padded (N, Fp) array,
    fused with ReLU.  gamma/beta are zero in padded lanes, so padded output
    lanes remain exactly zero."""
    mask = jax.lax.broadcasted_iota(jnp.int32, x.shape, 1) < f_real
    inv_f = 1.0 / float(f_real)
    mean = jnp.sum(x, axis=-1, keepdims=True) * inv_f          # pad lanes are 0
    centered = jnp.where(mask, x - mean, 0.0)
    var = jnp.sum(centered * centered, axis=-1, keepdims=True) * inv_f
    y = (x - mean) * jax.lax.rsqrt(var + eps)
    y = y * gamma + beta
    return jnp.maximum(y, 0.0)


# ------------------------------ fused kernels --------------------------------

def _fc_in_kernel(x_ref, w1_ref, b1_ref, g1_ref, be1_ref, w2_ref, b2_ref,
                  o_ref, *, hidden_real):
    """fc_in: Linear -> LayerNorm -> ReLU -> (Dropout=id) -> Linear, fused."""
    h = jnp.dot(x_ref[...], w1_ref[...],
                preferred_element_type=jnp.float32) + b1_ref[...]
    h = _masked_layernorm_relu(h, g1_ref[...], be1_ref[...], hidden_real)
    o_ref[...] = (jnp.dot(h, w2_ref[...],
                          preferred_element_type=jnp.float32) + b2_ref[...])


def _layer_kernel(h_ref, pe_ref,
                  wq_ref, bq_ref, wk_ref, bk_ref, wv_ref, bv_ref,
                  wf1_ref, bf1_ref, gf1_ref, bef1_ref,
                  wf2_ref, bf2_ref, gf2_ref, bef2_ref,
                  o_ref, attn_sc,
                  *, heads, head_dim, hc_real, hidden_real):
    """One transformer layer, fully fused:
       q/k/v projections + dense multi-head attention + FF block, VMEM-resident."""
    h = h_ref[...]                    # (N, LANE), padded lanes are exactly 0
    x_qk = h + pe_ref[...]            # pos_enc added for q and k inputs only

    # Projections. 1/sqrt(C) is pre-folded into wq/bq by the wrapper.
    q = jnp.dot(x_qk, wq_ref[...], preferred_element_type=jnp.float32) + bq_ref[...]
    k = jnp.dot(x_qk, wk_ref[...], preferred_element_type=jnp.float32) + bk_ref[...]
    v = jnp.dot(h,    wv_ref[...], preferred_element_type=jnp.float32) + bv_ref[...]

    # Per-head attention (static unroll over heads; heads are lane slices).
    for hd in range(heads):
        sl = slice(hd * head_dim, (hd + 1) * head_dim)
        qh, kh, vh = q[:, sl], k[:, sl], v[:, sl]
        s = jax.lax.dot_general(qh, kh, (((1,), (1,)), ((), ())),
                                preferred_element_type=jnp.float32)   # q @ k^T
        s = s - jnp.max(s, axis=-1, keepdims=True)
        p = jnp.exp(s)
        denom = jnp.sum(p, axis=-1, keepdims=True)
        # approx=True would move this to the EUP; kept exact for f32 parity.
        p = p * pl.reciprocal(denom, approx=False)
        attn_sc[:, sl] = jnp.dot(p, vh, preferred_element_type=jnp.float32)

    o = attn_sc[...]                  # (N, H*C)  'n h d -> n (h d)' for free

    # FF block: Linear -> LN -> ReLU -> Linear -> LN -> ReLU (dropout = id).
    f = jnp.dot(o, wf1_ref[...], preferred_element_type=jnp.float32) + bf1_ref[...]
    f = _masked_layernorm_relu(f, gf1_ref[...], bef1_ref[...], hc_real)
    f = jnp.dot(f, wf2_ref[...], preferred_element_type=jnp.float32) + bf2_ref[...]
    o_ref[...] = _masked_layernorm_relu(f, gf2_ref[...], bef2_ref[...], hidden_real)


def _fc_out_kernel(h_ref, w_ref, b_ref, o_ref):
    o_ref[...] = (jnp.dot(h_ref[...], w_ref[...],
                          preferred_element_type=jnp.float32) + b_ref[...])


# ------------------------------ pallas wrapper --------------------------------

def _call_fused(kernel, args, out_shape, scratch_shapes=()):
    """Single-block pallas_call: every (2-D) operand is a full-array VMEM tile."""
    in_specs = [pl.BlockSpec(a.shape, lambda i: (0, 0)) for a in args]
    return pl.pallas_call(
        kernel,
        out_shape=out_shape,
        grid=(1,),
        in_specs=in_specs,
        out_specs=pl.BlockSpec(out_shape.shape, lambda i: (0, 0)),
        scratch_shapes=list(scratch_shapes),
        compiler_params=pltpu.CompilerParams(dimension_semantics=("arbitrary",)),
    )(*args)


# --------------------------- parameter handling -------------------------------

def _init_linear(key, fan_in, fan_out):
    kw, kb = jax.random.split(key)
    lim = 1.0 / math.sqrt(fan_in)
    w = jax.random.uniform(kw, (fan_in, fan_out), jnp.float32, -lim, lim)
    b = jax.random.uniform(kb, (fan_out,), jnp.float32, -lim, lim)
    return w, b


def init_params(key, in_ch, hidden, out_ch, heads, num_layers):
    """Real-sized parameters (same layout the PyTorch module would have)."""
    keys = jax.random.split(key, 3 + num_layers)
    p = {}
    k1, k2 = jax.random.split(keys[0])
    w1, b1 = _init_linear(k1, in_ch, hidden)
    w2, b2 = _init_linear(k2, hidden, hidden)
    p["fc_in"] = dict(w1=w1, b1=b1, g1=jnp.ones(hidden), be1=jnp.zeros(hidden),
                      w2=w2, b2=b2)
    hc = heads * hidden
    layers = []
    for li in range(num_layers):
        ks = jax.random.split(keys[1 + li], 5)
        wq, bq = _init_linear(ks[0], hidden, hc)
        wk, bk = _init_linear(ks[1], hidden, hc)
        wv, bv = _init_linear(ks[2], hidden, hc)
        wf1, bf1 = _init_linear(ks[3], hc, hc)
        wf2, bf2 = _init_linear(ks[4], hc, hidden)
        layers.append(dict(
            wq=wq, bq=bq, wk=wk, bk=bk, wv=wv, bv=bv,
            wf1=wf1, bf1=bf1, gf1=jnp.ones(hc), bef1=jnp.zeros(hc),
            wf2=wf2, bf2=bf2, gf2=jnp.ones(hidden), bef2=jnp.zeros(hidden)))
    p["layers"] = layers
    wo, bo = _init_linear(keys[-1], hidden, out_ch)
    p["fc_out"] = dict(w=wo, b=bo)
    return p


def _pad2(a, rows, cols):
    out = jnp.zeros((rows, cols), jnp.float32)
    return out.at[: a.shape[0], : a.shape[1]].set(a)


def _pad_row(a, cols):
    out = jnp.zeros((1, cols), jnp.float32)
    return out.at[0, : a.shape[0]].set(a)


def pad_params(params, heads, hidden):
    """Zero-pad feature dims to the 128-lane width and fold the attention scale
    into the q projection.  gamma/beta are padded with ZEROS so LayerNorm output
    stays exactly zero in padded lanes."""
    hc = heads * hidden
    scale = 1.0 / math.sqrt(hidden)
    fi = params["fc_in"]
    p = {"fc_in": dict(
        w1=_pad2(fi["w1"], fi["w1"].shape[0], LANE),
        b1=_pad_row(fi["b1"], LANE),
        g1=_pad_row(fi["g1"], LANE),
        be1=_pad_row(fi["be1"], LANE),
        w2=_pad2(fi["w2"], LANE, LANE),
        b2=_pad_row(fi["b2"], LANE),
    )}
    layers = []
    for lp in params["layers"]:
        layers.append(dict(
            wq=_pad2(lp["wq"] * scale, LANE, hc),
            bq=_pad_row(lp["bq"] * scale, hc),
            wk=_pad2(lp["wk"], LANE, hc),
            bk=_pad_row(lp["bk"], hc),
            wv=_pad2(lp["wv"], LANE, hc),
            bv=_pad_row(lp["bv"], hc),
            wf1=_pad2(lp["wf1"], hc, LANE),
            bf1=_pad_row(lp["bf1"], LANE),
            gf1=_pad_row(lp["gf1"], LANE),
            bef1=_pad_row(lp["bef1"], LANE),
            wf2=_pad2(lp["wf2"], LANE, LANE),
            bf2=_pad_row(lp["bf2"], LANE),
            gf2=_pad_row(lp["gf2"], LANE),
            bef2=_pad_row(lp["bef2"], LANE),
        ))
    p["layers"] = layers
    fo = params["fc_out"]
    p["fc_out"] = dict(w=_pad2(fo["w"], LANE, fo["w"].shape[1]),
                       b=_pad_row(fo["b"], fo["b"].shape[0]))
    return p


# ------------------------------ model forward ---------------------------------

def transformer_forward(padded, x, pos_enc_padded, *, heads, hidden):
    """Pallas implementation of Transformer.forward (global / flash path).
    `padded` comes from pad_params(); pos_enc_padded is (N, LANE)."""
    N = x.shape[0]
    hc = heads * hidden

    fi = padded["fc_in"]
    h = _call_fused(
        functools.partial(_fc_in_kernel, hidden_real=hidden),
        [x, fi["w1"], fi["b1"], fi["g1"], fi["be1"], fi["w2"], fi["b2"]],
        jax.ShapeDtypeStruct((N, LANE), jnp.float32),
    )

    for lp in padded["layers"]:
        h = _call_fused(
            functools.partial(_layer_kernel, heads=heads, head_dim=hidden,
                              hc_real=hc, hidden_real=hidden),
            [h, pos_enc_padded,
             lp["wq"], lp["bq"], lp["wk"], lp["bk"], lp["wv"], lp["bv"],
             lp["wf1"], lp["bf1"], lp["gf1"], lp["bef1"],
             lp["wf2"], lp["bf2"], lp["gf2"], lp["bef2"]],
            jax.ShapeDtypeStruct((N, LANE), jnp.float32),
            scratch_shapes=[pltpu.VMEM((N, hc), jnp.float32)],
        )

    fo = padded["fc_out"]
    return _call_fused(
        _fc_out_kernel,
        [h, fo["w"], fo["b"]],
        jax.ShapeDtypeStruct((N, fo["w"].shape[1]), jnp.float32),
    )


# ------------------------------ pure-JAX reference -----------------------------

def _ref_forward(params, x, pos_enc, heads, hidden):
    C = hidden
    scale = 1.0 / math.sqrt(C)
    N = x.shape[0]

    def lin(z, w, b):
        return z @ w + b

    def ln(z, g, be):
        m = z.mean(-1, keepdims=True)
        v = ((z - m) ** 2).mean(-1, keepdims=True)
        return (z - m) / jnp.sqrt(v + 1e-5) * g + be

    fi = params["fc_in"]
    h = lin(x, fi["w1"], fi["b1"])
    h = jax.nn.relu(ln(h, fi["g1"], fi["be1"]))
    h = lin(h, fi["w2"], fi["b2"])
    for lp in params["layers"]:
        x_qk = h + pos_enc
        q = lin(x_qk, lp["wq"], lp["bq"]).reshape(N, heads, C).transpose(1, 0, 2)
        k = lin(x_qk, lp["wk"], lp["bk"]).reshape(N, heads, C).transpose(1, 0, 2)
        v = lin(h, lp["wv"], lp["bv"]).reshape(N, heads, C).transpose(1, 0, 2)
        s = jnp.einsum("hid,hjd->hij", q, k) * scale
        a = jax.nn.softmax(s, axis=-1)
        o = jnp.einsum("hij,hjd->hid", a, v).transpose(1, 0, 2).reshape(N, heads * C)
        f = lin(o, lp["wf1"], lp["bf1"])
        f = jax.nn.relu(ln(f, lp["gf1"], lp["bef1"]))
        f = lin(f, lp["wf2"], lp["bf2"])
        h = jax.nn.relu(ln(f, lp["gf2"], lp["bef2"]))
    fo = params["fc_out"]
    return lin(h, fo["w"], fo["b"])


# ----------------------------------- main ---------------------------------------

if __name__ == "__main__":
    # Small, module-consistent shapes.
    num_nodes = 64
    in_channels = 16
    hidden_channels = 32
    out_channels = 8
    heads = 2
    num_layers = 2

    root = jax.random.PRNGKey(0)
    k_params, k_x, k_pe = jax.random.split(root, 3)

    params = init_params(k_params, in_channels, hidden_channels, out_channels,
                         heads, num_layers)
    padded = pad_params(params, heads, hidden_channels)

    x = jax.random.normal(k_x, (num_nodes, in_channels), jnp.float32)
    pos_enc = jax.random.normal(k_pe, (num_nodes, hidden_channels), jnp.float32)
    pos_enc_p = jnp.pad(pos_enc, ((0, 0), (0, LANE - hidden_channels)))
    batch_idx = jnp.arange(num_nodes)               # all nodes in the batch
    # edge_index / edge_attr are unused in the conv_type='global' path.
    edge_index = jnp.zeros((2, 128), jnp.int32)     # dummy
    edge_attr = jnp.zeros((2, 128), jnp.int32)      # dummy

    fwd = jax.jit(functools.partial(transformer_forward,
                                    heads=heads, hidden=hidden_channels))
    out = fwd(padded, x, pos_enc_p)
    out = jax.block_until_ready(out)
    assert out.shape == (num_nodes, out_channels)

    ref = _ref_forward(params, x, pos_enc, heads, hidden_channels)
    assert jnp.allclose(out, ref, atol=1e-3, rtol=1e-3), \
        f"max err {jnp.max(jnp.abs(out - ref))}"

    print("KERNEL_OK")
</pallas_src>

<mosaic_0001>
module attributes {stable_mosaic.version = 11 : i64} {
  func.func @_layer_kernel(%arg0: i32, %arg1: memref<64x128xf32, #tpu.memory_space<vmem>>, %arg2: memref<64x128xf32, #tpu.memory_space<vmem>>, %arg3: memref<128x64xf32, #tpu.memory_space<vmem>>, %arg4: memref<1x64xf32, #tpu.memory_space<vmem>>, %arg5: memref<128x64xf32, #tpu.memory_space<vmem>>, %arg6: memref<1x64xf32, #tpu.memory_space<vmem>>, %arg7: memref<128x64xf32, #tpu.memory_space<vmem>>, %arg8: memref<1x64xf32, #tpu.memory_space<vmem>>, %arg9: memref<64x128xf32, #tpu.memory_space<vmem>>, %arg10: memref<1x128xf32, #tpu.memory_space<vmem>>, %arg11: memref<1x128xf32, #tpu.memory_space<vmem>>, %arg12: memref<1x128xf32, #tpu.memory_space<vmem>>, %arg13: memref<128x128xf32, #tpu.memory_space<vmem>>, %arg14: memref<1x128xf32, #tpu.memory_space<vmem>>, %arg15: memref<1x128xf32, #tpu.memory_space<vmem>>, %arg16: memref<1x128xf32, #tpu.memory_space<vmem>>, %arg17: memref<64x128xf32, #tpu.memory_space<vmem>>, %arg18: memref<64x64xf32, #tpu.memory_space<vmem>>) attributes {dimension_semantics = [#tpu.dimension_semantics<arbitrary>], iteration_bounds = array<i64: 1>, scalar_prefetch = 0 : i64, scratch_operands = 1 : i64, tpu.core_type = #tpu.core_type<tc>, window_params = [{pipeline_mode = #tpu.pipeline_mode<synchronous>, transform_indices = @transform_0, window_bounds = array<i64: 64, 128>}, {pipeline_mode = #tpu.pipeline_mode<synchronous>, transform_indices = @transform_1, window_bounds = array<i64: 64, 128>}, {pipeline_mode = #tpu.pipeline_mode<synchronous>, transform_indices = @transform_2, window_bounds = array<i64: 128, 64>}, {pipeline_mode = #tpu.pipeline_mode<synchronous>, transform_indices = @transform_3, window_bounds = array<i64: 1, 64>}, {pipeline_mode = #tpu.pipeline_mode<synchronous>, transform_indices = @transform_4, window_bounds = array<i64: 128, 64>}, {pipeline_mode = #tpu.pipeline_mode<synchronous>, transform_indices = @transform_5, window_bounds = array<i64: 1, 64>}, {pipeline_mode = #tpu.pipeline_mode<synchronous>, transform_indices = @transform_6, window_bounds = array<i64: 128, 64>}, {pipeline_mode = #tpu.pipeline_mode<synchronous>, transform_indices = @transform_7, window_bounds = array<i64: 1, 64>}, {pipeline_mode = #tpu.pipeline_mode<synchronous>, transform_indices = @transform_8, window_bounds = array<i64: 64, 128>}, {pipeline_mode = #tpu.pipeline_mode<synchronous>, transform_indices = @transform_9, window_bounds = array<i64: 1, 128>}, {pipeline_mode = #tpu.pipeline_mode<synchronous>, transform_indices = @transform_10, window_bounds = array<i64: 1, 128>}, {pipeline_mode = #tpu.pipeline_mode<synchronous>, transform_indices = @transform_11, window_bounds = array<i64: 1, 128>}, {pipeline_mode = #tpu.pipeline_mode<synchronous>, transform_indices = @transform_12, window_bounds = array<i64: 128, 128>}, {pipeline_mode = #tpu.pipeline_mode<synchronous>, transform_indices = @transform_13, window_bounds = array<i64: 1, 128>}, {pipeline_mode = #tpu.pipeline_mode<synchronous>, transform_indices = @transform_14, window_bounds = array<i64: 1, 128>}, {pipeline_mode = #tpu.pipeline_mode<synchronous>, transform_indices = @transform_15, window_bounds = array<i64: 1, 128>}, {pipeline_mode = #tpu.pipeline_mode<synchronous>, transform_indices = @transform_16, window_bounds = array<i64: 64, 128>}]} {
    %c0 = arith.constant 0 : index
    %c0_0 = arith.constant 0 : index
    %0 = vector.load %arg1[%c0, %c0_0] : memref<64x128xf32, #tpu.memory_space<vmem>>, vector<64x128xf32>
    %c0_1 = arith.constant 0 : index
    %c0_2 = arith.constant 0 : index
    %1 = vector.load %arg2[%c0_1, %c0_2] : memref<64x128xf32, #tpu.memory_space<vmem>>, vector<64x128xf32>
    %2 = arith.addf %0, %1 : vector<64x128xf32>
    %c0_3 = arith.constant 0 : index
    %c0_4 = arith.constant 0 : index
    %3 = vector.load %arg3[%c0_3, %c0_4] : memref<128x64xf32, #tpu.memory_space<vmem>>, vector<128x64xf32>
    %cst = arith.constant dense<0.000000e+00> : vector<64x64xf32>
    %4 = tpu.matmul %2, %3, %cst {dimension_numbers = #tpu.dot_dimension_numbers<[1], [0], [0], [1], [0, 0, 1, 1], [], []>} : vector<64x128xf32>, vector<128x64xf32>, vector<64x64xf32> -> vector<64x64xf32>
    %c0_5 = arith.constant 0 : index
    %c0_6 = arith.constant 0 : index
    %5 = vector.load %arg4[%c0_5, %c0_6] : memref<1x64xf32, #tpu.memory_space<vmem>>, vector<1x64xf32>
    %6 = vector.broadcast %5 : vector<1x64xf32> to vector<64x64xf32>
    %7 = arith.addf %4, %6 : vector<64x64xf32>
    %c0_7 = arith.constant 0 : index
    %c0_8 = arith.constant 0 : index
    %8 = vector.load %arg5[%c0_7, %c0_8] : memref<128x64xf32, #tpu.memory_space<vmem>>, vector<128x64xf32>
    %cst_9 = arith.constant dense<0.000000e+00> : vector<64x64xf32>
    %9 = tpu.matmul %2, %8, %cst_9 {dimension_numbers = #tpu.dot_dimension_numbers<[1], [0], [0], [1], [0, 0, 1, 1], [], []>} : vector<64x128xf32>, vector<128x64xf32>, vector<64x64xf32> -> vector<64x64xf32>
    %c0_10 = arith.constant 0 : index
    %c0_11 = arith.constant 0 : index
    %10 = vector.load %arg6[%c0_10, %c0_11] : memref<1x64xf32, #tpu.memory_space<vmem>>, vector<1x64xf32>
    %11 = vector.broadcast %10 : vector<1x64xf32> to vector<64x64xf32>
    %12 = arith.addf %9, %11 : vector<64x64xf32>
    %c0_12 = arith.constant 0 : index
    %c0_13 = arith.constant 0 : index
    %13 = vector.load %arg7[%c0_12, %c0_13] : memref<128x64xf32, #tpu.memory_space<vmem>>, vector<128x64xf32>
    %cst_14 = arith.constant dense<0.000000e+00> : vector<64x64xf32>
    %14 = tpu.matmul %0, %13, %cst_14 {dimension_numbers = #tpu.dot_dimension_numbers<[1], [0], [0], [1], [0, 0, 1, 1], [], []>} : vector<64x128xf32>, vector<128x64xf32>, vector<64x64xf32> -> vector<64x64xf32>
    %c0_15 = arith.constant 0 : index
    %c0_16 = arith.constant 0 : index
    %15 = vector.load %arg8[%c0_15, %c0_16] : memref<1x64xf32, #tpu.memory_space<vmem>>, vector<1x64xf32>
    %16 = vector.broadcast %15 : vector<1x64xf32> to vector<64x64xf32>
    %17 = arith.addf %14, %16 : vector<64x64xf32>
    %18 = vector.extract_strided_slice %7 {offsets = [0, 0], sizes = [64, 32], strides = [1, 1]} : vector<64x64xf32> to vector<64x32xf32>
    %19 = vector.extract_strided_slice %12 {offsets = [0, 0], sizes = [64, 32], strides = [1, 1]} : vector<64x64xf32> to vector<64x32xf32>
    %20 = vector.extract_strided_slice %17 {offsets = [0, 0], sizes = [64, 32], strides = [1, 1]} : vector<64x64xf32> to vector<64x32xf32>
    %cst_17 = arith.constant dense<0.000000e+00> : vector<64x64xf32>
    %21 = tpu.matmul %18, %19, %cst_17 {dimension_numbers = #tpu.dot_dimension_numbers<[1], [1], [0], [0], [0, 0, 1, 0], [], []>} : vector<64x32xf32>, vector<64x32xf32>, vector<64x64xf32> -> vector<64x64xf32>
    %cst_18 = arith.constant dense<0xFF800000> : vector<64xf32>
    %22 = vector.multi_reduction <maximumf>, %21, %cst_18 [1] : vector<64x64xf32> to vector<64xf32>
    %23 = vector.shape_cast %22 : vector<64xf32> to vector<64x1xf32>
    %24 = vector.broadcast %23 : vector<64x1xf32> to vector<64x64xf32>
    %25 = arith.subf %21, %24 : vector<64x64xf32>
    %26 = math.exp %25 : vector<64x64xf32>
    %cst_19 = arith.constant dense<0.000000e+00> : vector<64xf32>
    %27 = vector.multi_reduction <add>, %26, %cst_19 [1] : vector<64x64xf32> to vector<64xf32>
    %28 = vector.shape_cast %27 : vector<64xf32> to vector<64x1xf32>
    %29 = tpu.reciprocal %28 : vector<64x1xf32> -> vector<64x1xf32>
    %30 = vector.broadcast %29 : vector<64x1xf32> to vector<64x64xf32>
    %31 = arith.mulf %26, %30 : vector<64x64xf32>
    %cst_20 = arith.constant dense<0.000000e+00> : vector<64x32xf32>
    %32 = tpu.matmul %31, %20, %cst_20 {dimension_numbers = #tpu.dot_dimension_numbers<[1], [0], [0], [1], [0, 0, 1, 1], [], []>} : vector<64x64xf32>, vector<64x32xf32>, vector<64x32xf32> -> vector<64x32xf32>
    %c0_21 = arith.constant 0 : index
    %c0_22 = arith.constant 0 : index
    %33 = vector.load %arg18[%c0_21, %c0_22] : memref<64x64xf32, #tpu.memory_space<vmem>>, vector<64x32xf32>
    tpu.vector_store %arg18[%c0_21, %c0_22], %32 {strides = array<i32>} : memref<64x64xf32, #tpu.memory_space<vmem>>, vector<64x32xf32>,
    %34 = vector.extract_strided_slice %7 {offsets = [0, 32], sizes = [64, 32], strides = [1, 1]} : vector<64x64xf32> to vector<64x32xf32>
    %35 = vector.extract_strided_slice %12 {offsets = [0, 32], sizes = [64, 32], strides = [1, 1]} : vector<64x64xf32> to vector<64x32xf32>
    %36 = vector.extract_strided_slice %17 {offsets = [0, 32], sizes = [64, 32], strides = [1, 1]} : vector<64x64xf32> to vector<64x32xf32>
    %cst_23 = arith.constant dense<0.000000e+00> : vector<64x64xf32>
    %37 = tpu.matmul %34, %35, %cst_23 {dimension_numbers = #tpu.dot_dimension_numbers<[1], [1], [0], [0], [0, 0, 1, 0], [], []>} : vector<64x32xf32>, vector<64x32xf32>, vector<64x64xf32> -> vector<64x64xf32>
    %cst_24 = arith.constant dense<0xFF800000> : vector<64xf32>
    %38 = vector.multi_reduction <maximumf>, %37, %cst_24 [1] : vector<64x64xf32> to vector<64xf32>
    %39 = vector.shape_cast %38 : vector<64xf32> to vector<64x1xf32>
    %40 = vector.broadcast %39 : vector<64x1xf32> to vector<64x64xf32>
    %41 = arith.subf %37, %40 : vector<64x64xf32>
    %42 = math.exp %41 : vector<64x64xf32>
    %cst_25 = arith.constant dense<0.000000e+00> : vector<64xf32>
    %43 = vector.multi_reduction <add>, %42, %cst_25 [1] : vector<64x64xf32> to vector<64xf32>
    %44 = vector.shape_cast %43 : vector<64xf32> to vector<64x1xf32>
    %45 = tpu.reciprocal %44 : vector<64x1xf32> -> vector<64x1xf32>
    %46 = vector.broadcast %45 : vector<64x1xf32> to vector<64x64xf32>
    %47 = arith.mulf %42, %46 : vector<64x64xf32>
    %cst_26 = arith.constant dense<0.000000e+00> : vector<64x32xf32>
    %48 = tpu.matmul %47, %36, %cst_26 {dimension_numbers = #tpu.dot_dimension_numbers<[1], [0], [0], [1], [0, 0, 1, 1], [], []>} : vector<64x64xf32>, vector<64x32xf32>, vector<64x32xf32> -> vector<64x32xf32>
    %c0_27 = arith.constant 0 : index
    %c32 = arith.constant 32 : index
    %49 = vector.load %arg18[%c0_27, %c32] : memref<64x64xf32, #tpu.memory_space<vmem>>, vector<64x32xf32>
    tpu.vector_store %arg18[%c0_27, %c32], %48 {strides = array<i32>} : memref<64x64xf32, #tpu.memory_space<vmem>>, vector<64x32xf32>,
    %c0_28 = arith.constant 0 : index
    %c0_29 = arith.constant 0 : index
    %50 = vector.load %arg18[%c0_28, %c0_29] : memref<64x64xf32, #tpu.memory_space<vmem>>, vector<64x64xf32>
    %c0_30 = arith.constant 0 : index
    %c0_31 = arith.constant 0 : index
    %51 = vector.load %arg9[%c0_30, %c0_31] : memref<64x128xf32, #tpu.memory_space<vmem>>, vector<64x128xf32>
    %cst_32 = arith.constant dense<0.000000e+00> : vector<64x128xf32>
    %52 = tpu.matmul %50, %51, %cst_32 {dimension_numbers = #tpu.dot_dimension_numbers<[1], [0], [0], [1], [0, 0, 1, 1], [], []>} : vector<64x64xf32>, vector<64x128xf32>, vector<64x128xf32> -> vector<64x128xf32>
    %c0_33 = arith.constant 0 : index
    %c0_34 = arith.constant 0 : index
    %53 = vector.load %arg10[%c0_33, %c0_34] : memref<1x128xf32, #tpu.memory_space<vmem>>, vector<1x128xf32>
    %54 = vector.broadcast %53 : vector<1x128xf32> to vector<64x128xf32>
    %55 = arith.addf %52, %54 : vector<64x128xf32>
    %c0_35 = arith.constant 0 : index
    %c0_36 = arith.constant 0 : index
    %56 = vector.load %arg11[%c0_35, %c0_36] : memref<1x128xf32, #tpu.memory_space<vmem>>, vector<1x128xf32>
    %c0_37 = arith.constant 0 : index
    %c0_38 = arith.constant 0 : index
    %57 = vector.load %arg12[%c0_37, %c0_38] : memref<1x128xf32, #tpu.memory_space<vmem>>, vector<1x128xf32>
    %58 = tpu.iota {dimensions = array<i32: 1>} : vector<64x128xi32>
    %c64_i32 = arith.constant 64 : i32
    %59 = vector.broadcast %c64_i32 : i32 to vector<64x128xi32>
    %60 = arith.cmpi slt, %58, %59 : vector<64x128xi32>
    %cst_39 = arith.constant dense<0.000000e+00> : vector<64xf32>
    %61 = vector.multi_reduction <add>, %55, %cst_39 [1] : vector<64x128xf32> to vector<64xf32>
    %62 = vector.shape_cast %61 : vector<64xf32> to vector<64x1xf32>
    %cst_40 = arith.constant 1.562500e-02 : f32
    %63 = vector.broadcast %cst_40 : f32 to vector<64x1xf32>
    %64 = arith.mulf %62, %63 : vector<64x1xf32>
    %65 = vector.broadcast %64 : vector<64x1xf32> to vector<64x128xf32>
    %66 = arith.subf %55, %65 : vector<64x128xf32>
    %cst_41 = arith.constant 0.000000e+00 : f32
    %67 = vector.broadcast %cst_41 : f32 to vector<64x128xf32>
    %68 = arith.select %60, %66, %67 : vector<64x128xi1>, vector<64x128xf32>
    %69 = arith.mulf %68, %68 : vector<64x128xf32>
    %cst_42 = arith.constant dense<0.000000e+00> : vector<64xf32>
    %70 = vector.multi_reduction <add>, %69, %cst_42 [1] : vector<64x128xf32> to vector<64xf32>
    %71 = vector.shape_cast %70 : vector<64xf32> to vector<64x1xf32>
    %cst_43 = arith.constant 1.562500e-02 : f32
    %72 = vector.broadcast %cst_43 : f32 to vector<64x1xf32>
    %73 = arith.mulf %71, %72 : vector<64x1xf32>
    %74 = vector.broadcast %64 : vector<64x1xf32> to vector<64x128xf32>
    %75 = arith.subf %55, %74 : vector<64x128xf32>
    %cst_44 = arith.constant 9.99999974E-6 : f32
    %76 = vector.broadcast %cst_44 : f32 to vector<64x1xf32>
    %77 = arith.addf %73, %76 : vector<64x1xf32>
    %78 = math.rsqrt %77 : vector<64x1xf32>
    %79 = vector.broadcast %78 : vector<64x1xf32> to vector<64x128xf32>
    %80 = arith.mulf %75, %79 : vector<64x128xf32>
    %81 = vector.broadcast %56 : vector<1x128xf32> to vector<64x128xf32>
    %82 = arith.mulf %80, %81 : vector<64x128xf32>
    %83 = vector.broadcast %57 : vector<1x128xf32> to vector<64x128xf32>
    %84 = arith.addf %82, %83 : vector<64x128xf32>
    %cst_45 = arith.constant 0.000000e+00 : f32
    %85 = vector.broadcast %cst_45 : f32 to vector<64x128xf32>
    %86 = arith.maximumf %84, %85 : vector<64x128xf32>
    %c0_46 = arith.constant 0 : index
    %c0_47 = arith.constant 0 : index
    %87 = vector.load %arg13[%c0_46, %c0_47] : memref<128x128xf32, #tpu.memory_space<vmem>>, vector<128x128xf32>
    %cst_48 = arith.constant dense<0.000000e+00> : vector<64x128xf32>
    %88 = tpu.matmul %86, %87, %cst_48 {dimension_numbers = #tpu.dot_dimension_numbers<[1], [0], [0], [1], [0, 0, 1, 1], [], []>} : vector<64x128xf32>, vector<128x128xf32>, vector<64x128xf32> -> vector<64x128xf32>
    %c0_49 = arith.constant 0 : index
    %c0_50 = arith.constant 0 : index
    %89 = vector.load %arg14[%c0_49, %c0_50] : memref<1x128xf32, #tpu.memory_space<vmem>>, vector<1x128xf32>
    %90 = vector.broadcast %89 : vector<1x128xf32> to vector<64x128xf32>
    %91 = arith.addf %88, %90 : vector<64x128xf32>
    %c0_51 = arith.constant 0 : index
    %c0_52 = arith.constant 0 : index
    %92 = vector.load %arg15[%c0_51, %c0_52] : memref<1x128xf32, #tpu.memory_space<vmem>>, vector<1x128xf32>
    %c0_53 = arith.constant 0 : index
    %c0_54 = arith.constant 0 : index
    %93 = vector.load %arg16[%c0_53, %c0_54] : memref<1x128xf32, #tpu.memory_space<vmem>>, vector<1x128xf32>
    %94 = tpu.iota {dimensions = array<i32: 1>} : vector<64x128xi32>
    %c32_i32 = arith.constant 32 : i32
    %95 = vector.broadcast %c32_i32 : i32 to vector<64x128xi32>
    %96 = arith.cmpi slt, %94, %95 : vector<64x128xi32>
    %cst_55 = arith.constant dense<0.000000e+00> : vector<64xf32>
    %97 = vector.multi_reduction <add>, %91, %cst_55 [1] : vector<64x128xf32> to vector<64xf32>
    %98 = vector.shape_cast %97 : vector<64xf32> to vector<64x1xf32>
    %cst_56 = arith.constant 3.125000e-02 : f32
    %99 = vector.broadcast %cst_56 : f32 to vector<64x1xf32>
    %100 = arith.mulf %98, %99 : vector<64x1xf32>
    %101 = vector.broadcast %100 : vector<64x1xf32> to vector<64x128xf32>
    %102 = arith.subf %91, %101 : vector<64x128xf32>
    %cst_57 = arith.constant 0.000000e+00 : f32
    %103 = vector.broadcast %cst_57 : f32 to vector<64x128xf32>
    %104 = arith.select %96, %102, %103 : vector<64x128xi1>, vector<64x128xf32>
    %105 = arith.mulf %104, %104 : vector<64x128xf32>
    %cst_58 = arith.constant dense<0.000000e+00> : vector<64xf32>
    %106 = vector.multi_reduction <add>, %105, %cst_58 [1] : vector<64x128xf32> to vector<64xf32>
    %107 = vector.shape_cast %106 : vector<64xf32> to vector<64x1xf32>
    %cst_59 = arith.constant 3.125000e-02 : f32
    %108 = vector.broadcast %cst_59 : f32 to vector<64x1xf32>
    %109 = arith.mulf %107, %108 : vector<64x1xf32>
    %110 = vector.broadcast %100 : vector<64x1xf32> to vector<64x128xf32>
    %111 = arith.subf %91, %110 : vector<64x128xf32>
    %cst_60 = arith.constant 9.99999974E-6 : f32
    %112 = vector.broadcast %cst_60 : f32 to vector<64x1xf32>
    %113 = arith.addf %109, %112 : vector<64x1xf32>
    %114 = math.rsqrt %113 : vector<64x1xf32>
    %115 = vector.broadcast %114 : vector<64x1xf32> to vector<64x128xf32>
    %116 = arith.mulf %111, %115 : vector<64x128xf32>
    %117 = vector.broadcast %92 : vector<1x128xf32> to vector<64x128xf32>
    %118 = arith.mulf %116, %117 : vector<64x128xf32>
    %119 = vector.broadcast %93 : vector<1x128xf32> to vector<64x128xf32>
    %120 = arith.addf %118, %119 : vector<64x128xf32>
    %cst_61 = arith.constant 0.000000e+00 : f32
    %121 = vector.broadcast %cst_61 : f32 to vector<64x128xf32>
    %122 = arith.maximumf %120, %121 : vector<64x128xf32>
    %c0_62 = arith.constant 0 : index
    %c0_63 = arith.constant 0 : index
    %123 = vector.load %arg17[%c0_62, %c0_63] : memref<64x128xf32, #tpu.memory_space<vmem>>, vector<64x128xf32>
    tpu.vector_store %arg17[%c0_62, %c0_63], %122 {strides = array<i32>} : memref<64x128xf32, #tpu.memory_space<vmem>>, vector<64x128xf32>,
    return
  }
  func.func @transform_0(%arg0: i32) -> (i32, i32) {
    %c0_i32 = arith.constant 0 : i32
    %c0_i32_0 = arith.constant 0 : i32
    %c0_i32_1 = arith.constant 0 : i32
    return %c0_i32, %c0_i32_0 : i32, i32
  }
  func.func @transform_1(%arg0: i32) -> (i32, i32) {
    %c0_i32 = arith.constant 0 : i32
    %c0_i32_0 = arith.constant 0 : i32
    %c0_i32_1 = arith.constant 0 : i32
    return %c0_i32, %c0_i32_0 : i32, i32
  }
  func.func @transform_2(%arg0: i32) -> (i32, i32) {
    %c0_i32 = arith.constant 0 : i32
    %c0_i32_0 = arith.constant 0 : i32
    %c0_i32_1 = arith.constant 0 : i32
    return %c0_i32, %c0_i32_0 : i32, i32
  }
  func.func @transform_3(%arg0: i32) -> (i32, i32) {
    %c0_i32 = arith.constant 0 : i32
    %c0_i32_0 = arith.constant 0 : i32
    %c0_i32_1 = arith.constant 0 : i32
    return %c0_i32, %c0_i32_0 : i32, i32
  }
  func.func @transform_4(%arg0: i32) -> (i32, i32) {
    %c0_i32 = arith.constant 0 : i32
    %c0_i32_0 = arith.constant 0 : i32
    %c0_i32_1 = arith.constant 0 : i32
    return %c0_i32, %c0_i32_0 : i32, i32
  }
  func.func @transform_5(%arg0: i32) -> (i32, i32) {
    %c0_i32 = arith.constant 0 : i32
    %c0_i32_0 = arith.constant 0 : i32
    %c0_i32_1 = arith.constant 0 : i32
    return %c0_i32, %c0_i32_0 : i32, i32
  }
  func.func @transform_6(%arg0: i32) -> (i32, i32) {
    %c0_i32 = arith.constant 0 : i32
    %c0_i32_0 = arith.constant 0 : i32
    %c0_i32_1 = arith.constant 0 : i32
    return %c0_i32, %c0_i32_0 : i32, i32
  }
  func.func @transform_7(%arg0: i32) -> (i32, i32) {
    %c0_i32 = arith.constant 0 : i32
    %c0_i32_0 = arith.constant 0 : i32
    %c0_i32_1 = arith.constant 0 : i32
    return %c0_i32, %c0_i32_0 : i32, i32
  }
  func.func @transform_8(%arg0: i32) -> (i32, i32) {
    %c0_i32 = arith.constant 0 : i32
    %c0_i32_0 = arith.constant 0 : i32
    %c0_i32_1 = arith.constant 0 : i32
    return %c0_i32, %c0_i32_0 : i32, i32
  }
  func.func @transform_9(%arg0: i32) -> (i32, i32) {
    %c0_i32 = arith.constant 0 : i32
    %c0_i32_0 = arith.constant 0 : i32
    %c0_i32_1 = arith.constant 0 : i32
    return %c0_i32, %c0_i32_0 : i32, i32
  }
  func.func @transform_10(%arg0: i32) -> (i32, i32) {
    %c0_i32 = arith.constant 0 : i32
    %c0_i32_0 = arith.constant 0 : i32
    %c0_i32_1 = arith.constant 0 : i32
    return %c0_i32, %c0_i32_0 : i32, i32
  }
  func.func @transform_11(%arg0: i32) -> (i32, i32) {
    %c0_i32 = arith.constant 0 : i32
    %c0_i32_0 = arith.constant 0 : i32
    %c0_i32_1 = arith.constant 0 : i32
    return %c0_i32, %c0_i32_0 : i32, i32
  }
  func.func @transform_12(%arg0: i32) -> (i32, i32) {
    %c0_i32 = arith.constant 0 : i32
    %c0_i32_0 = arith.constant 0 : i32
    %c0_i32_1 = arith.constant 0 : i32
    return %c0_i32, %c0_i32_0 : i32, i32
  }
  func.func @transform_13(%arg0: i32) -> (i32, i32) {
    %c0_i32 = arith.constant 0 : i32
    %c0_i32_0 = arith.constant 0 : i32
    %c0_i32_1 = arith.constant 0 : i32
    return %c0_i32, %c0_i32_0 : i32, i32
  }
  func.func @transform_14(%arg0: i32) -> (i32, i32) {
    %c0_i32 = arith.constant 0 : i32
    %c0_i32_0 = arith.constant 0 : i32
    %c0_i32_1 = arith.constant 0 : i32
    return %c0_i32, %c0_i32_0 : i32, i32
  }
  func.func @transform_15(%arg0: i32) -> (i32, i32) {
    %c0_i32 = arith.constant 0 : i32
    %c0_i32_0 = arith.constant 0 : i32
    %c0_i32_1 = arith.constant 0 : i32
    return %c0_i32, %c0_i32_0 : i32, i32
  }
  func.func @transform_16(%arg0: i32) -> (i32, i32) {
    %c0_i32 = arith.constant 0 : i32
    %c0_i32_0 = arith.constant 0 : i32
    %c0_i32_1 = arith.constant 0 : i32
    return %c0_i32, %c0_i32_0 : i32, i32
  }
}

module attributes {stable_mosaic.version = 11 : i64} {
  func.func @_fc_in_kernel(%arg0: i32, %arg1: memref<64x16xf32, #tpu.memory_space<vmem>>, %arg2: memref<16x128xf32, #tpu.memory_space<vmem>>, %arg3: memref<1x128xf32, #tpu.memory_space<vmem>>, %arg4: memref<1x128xf32, #tpu.memory_space<vmem>>, %arg5: memref<1x128xf32, #tpu.memory_space<vmem>>, %arg6: memref<128x128xf32, #tpu.memory_space<vmem>>, %arg7: memref<1x128xf32, #tpu.memory_space<vmem>>, %arg8: memref<64x128xf32, #tpu.memory_space<vmem>>) attributes {dimension_semantics = [#tpu.dimension_semantics<arbitrary>], iteration_bounds = array<i64: 1>, scalar_prefetch = 0 : i64, scratch_operands = 0 : i64, tpu.core_type = #tpu.core_type<tc>, window_params = [{pipeline_mode = #tpu.pipeline_mode<synchronous>, transform_indices = @transform_0, window_bounds = array<i64: 64, 16>}, {pipeline_mode = #tpu.pipeline_mode<synchronous>, transform_indices = @transform_1, window_bounds = array<i64: 16, 128>}, {pipeline_mode = #tpu.pipeline_mode<synchronous>, transform_indices = @transform_2, window_bounds = array<i64: 1, 128>}, {pipeline_mode = #tpu.pipeline_mode<synchronous>, transform_indices = @transform_3, window_bounds = array<i64: 1, 128>}, {pipeline_mode = #tpu.pipeline_mode<synchronous>, transform_indices = @transform_4, window_bounds = array<i64: 1, 128>}, {pipeline_mode = #tpu.pipeline_mode<synchronous>, transform_indices = @transform_5, window_bounds = array<i64: 128, 128>}, {pipeline_mode = #tpu.pipeline_mode<synchronous>, transform_indices = @transform_6, window_bounds = array<i64: 1, 128>}, {pipeline_mode = #tpu.pipeline_mode<synchronous>, transform_indices = @transform_7, window_bounds = array<i64: 64, 128>}]} {
    %c0 = arith.constant 0 : index
    %c0_0 = arith.constant 0 : index
    %0 = vector.load %arg1[%c0, %c0_0] : memref<64x16xf32, #tpu.memory_space<vmem>>, vector<64x16xf32>
    %c0_1 = arith.constant 0 : index
    %c0_2 = arith.constant 0 : index
    %1 = vector.load %arg2[%c0_1, %c0_2] : memref<16x128xf32, #tpu.memory_space<vmem>>, vector<16x128xf32>
    %cst = arith.constant dense<0.000000e+00> : vector<64x128xf32>
    %2 = tpu.matmul %0, %1, %cst {dimension_numbers = #tpu.dot_dimension_numbers<[1], [0], [0], [1], [0, 0, 1, 1], [], []>} : vector<64x16xf32>, vector<16x128xf32>, vector<64x128xf32> -> vector<64x128xf32>
    %c0_3 = arith.constant 0 : index
    %c0_4 = arith.constant 0 : index
    %3 = vector.load %arg3[%c0_3, %c0_4] : memref<1x128xf32, #tpu.memory_space<vmem>>, vector<1x128xf32>
    %4 = vector.broadcast %3 : vector<1x128xf32> to vector<64x128xf32>
    %5 = arith.addf %2, %4 : vector<64x128xf32>
    %c0_5 = arith.constant 0 : index
    %c0_6 = arith.constant 0 : index
    %6 = vector.load %arg4[%c0_5, %c0_6] : memref<1x128xf32, #tpu.memory_space<vmem>>, vector<1x128xf32>
    %c0_7 = arith.constant 0 : index
    %c0_8 = arith.constant 0 : index
    %7 = vector.load %arg5[%c0_7, %c0_8] : memref<1x128xf32, #tpu.memory_space<vmem>>, vector<1x128xf32>
    %8 = tpu.iota {dimensions = array<i32: 1>} : vector<64x128xi32>
    %c32_i32 = arith.constant 32 : i32
    %9 = vector.broadcast %c32_i32 : i32 to vector<64x128xi32>
    %10 = arith.cmpi slt, %8, %9 : vector<64x128xi32>
    %cst_9 = arith.constant dense<0.000000e+00> : vector<64xf32>
    %11 = vector.multi_reduction <add>, %5, %cst_9 [1] : vector<64x128xf32> to vector<64xf32>
    %12 = vector.shape_cast %11 : vector<64xf32> to vector<64x1xf32>
    %cst_10 = arith.constant 3.125000e-02 : f32
    %13 = vector.broadcast %cst_10 : f32 to vector<64x1xf32>
    %14 = arith.mulf %12, %13 : vector<64x1xf32>
    %15 = vector.broadcast %14 : vector<64x1xf32> to vector<64x128xf32>
    %16 = arith.subf %5, %15 : vector<64x128xf32>
    %cst_11 = arith.constant 0.000000e+00 : f32
    %17 = vector.broadcast %cst_11 : f32 to vector<64x128xf32>
    %18 = arith.select %10, %16, %17 : vector<64x128xi1>, vector<64x128xf32>
    %19 = arith.mulf %18, %18 : vector<64x128xf32>
    %cst_12 = arith.constant dense<0.000000e+00> : vector<64xf32>
    %20 = vector.multi_reduction <add>, %19, %cst_12 [1] : vector<64x128xf32> to vector<64xf32>
    %21 = vector.shape_cast %20 : vector<64xf32> to vector<64x1xf32>
    %cst_13 = arith.constant 3.125000e-02 : f32
    %22 = vector.broadcast %cst_13 : f32 to vector<64x1xf32>
    %23 = arith.mulf %21, %22 : vector<64x1xf32>
    %24 = vector.broadcast %14 : vector<64x1xf32> to vector<64x128xf32>
    %25 = arith.subf %5, %24 : vector<64x128xf32>
    %cst_14 = arith.constant 9.99999974E-6 : f32
    %26 = vector.broadcast %cst_14 : f32 to vector<64x1xf32>
    %27 = arith.addf %23, %26 : vector<64x1xf32>
    %28 = math.rsqrt %27 : vector<64x1xf32>
    %29 = vector.broadcast %28 : vector<64x1xf32> to vector<64x128xf32>
    %30 = arith.mulf %25, %29 : vector<64x128xf32>
    %31 = vector.broadcast %6 : vector<1x128xf32> to vector<64x128xf32>
    %32 = arith.mulf %30, %31 : vector<64x128xf32>
    %33 = vector.broadcast %7 : vector<1x128xf32> to vector<64x128xf32>
    %34 = arith.addf %32, %33 : vector<64x128xf32>
    %cst_15 = arith.constant 0.000000e+00 : f32
    %35 = vector.broadcast %cst_15 : f32 to vector<64x128xf32>
    %36 = arith.maximumf %34, %35 : vector<64x128xf32>
    %c0_16 = arith.constant 0 : index
    %c0_17 = arith.constant 0 : index
    %37 = vector.load %arg6[%c0_16, %c0_17] : memref<128x128xf32, #tpu.memory_space<vmem>>, vector<128x128xf32>
    %cst_18 = arith.constant dense<0.000000e+00> : vector<64x128xf32>
    %38 = tpu.matmul %36, %37, %cst_18 {dimension_numbers = #tpu.dot_dimension_numbers<[1], [0], [0], [1], [0, 0, 1, 1], [], []>} : vector<64x128xf32>, vector<128x128xf32>, vector<64x128xf32> -> vector<64x128xf32>
    %c0_19 = arith.constant 0 : index
    %c0_20 = arith.constant 0 : index
    %39 = vector.load %arg7[%c0_19, %c0_20] : memref<1x128xf32, #tpu.memory_space<vmem>>, vector<1x128xf32>
    %40 = vector.broadcast %39 : vector<1x128xf32> to vector<64x128xf32>
    %41 = arith.addf %38, %40 : vector<64x128xf32>
    %c0_21 = arith.constant 0 : index
    %c0_22 = arith.constant 0 : index
    %42 = vector.load %arg8[%c0_21, %c0_22] : memref<64x128xf32, #tpu.memory_space<vmem>>, vector<64x128xf32>
    tpu.vector_store %arg8[%c0_21, %c0_22], %41 {strides = array<i32>} : memref<64x128xf32, #tpu.memory_space<vmem>>, vector<64x128xf32>,
    return
  }
  func.func @transform_0(%arg0: i32) -> (i32, i32) {
    %c0_i32 = arith.constant 0 : i32
    %c0_i32_0 = arith.constant 0 : i32
    %c0_i32_1 = arith.constant 0 : i32
    return %c0_i32, %c0_i32_0 : i32, i32
  }
  func.func @transform_1(%arg0: i32) -> (i32, i32) {
    %c0_i32 = arith.constant 0 : i32
    %c0_i32_0 = arith.constant 0 : i32
    %c0_i32_1 = arith.constant 0 : i32
    return %c0_i32, %c0_i32_0 : i32, i32
  }
  func.func @transform_2(%arg0: i32) -> (i32, i32) {
    %c0_i32 = arith.constant 0 : i32
    %c0_i32_0 = arith.constant 0 : i32
    %c0_i32_1 = arith.constant 0 : i32
    return %c0_i32, %c0_i32_0 : i32, i32
  }
  func.func @transform_3(%arg0: i32) -> (i32, i32) {
    %c0_i32 = arith.constant 0 : i32
    %c0_i32_0 = arith.constant 0 : i32
    %c0_i32_1 = arith.constant 0 : i32
    return %c0_i32, %c0_i32_0 : i32, i32
  }
  func.func @transform_4(%arg0: i32) -> (i32, i32) {
    %c0_i32 = arith.constant 0 : i32
    %c0_i32_0 = arith.constant 0 : i32
    %c0_i32_1 = arith.constant 0 : i32
    return %c0_i32, %c0_i32_0 : i32, i32
  }
  func.func @transform_5(%arg0: i32) -> (i32, i32) {
    %c0_i32 = arith.constant 0 : i32
    %c0_i32_0 = arith.constant 0 : i32
    %c0_i32_1 = arith.constant 0 : i32
    return %c0_i32, %c0_i32_0 : i32, i32
  }
  func.func @transform_6(%arg0: i32) -> (i32, i32) {
    %c0_i32 = arith.constant 0 : i32
    %c0_i32_0 = arith.constant 0 : i32
    %c0_i32_1 = arith.constant 0 : i32
    return %c0_i32, %c0_i32_0 : i32, i32
  }
  func.func @transform_7(%arg0: i32) -> (i32, i32) {
    %c0_i32 = arith.constant 0 : i32
    %c0_i32_0 = arith.constant 0 : i32
    %c0_i32_1 = arith.constant 0 : i32
    return %c0_i32, %c0_i32_0 : i32, i32
  }
}

module attributes {stable_mosaic.version = 11 : i64} {
  func.func @_fc_out_kernel(%arg0: i32, %arg1: memref<64x128xf32, #tpu.memory_space<vmem>>, %arg2: memref<128x8xf32, #tpu.memory_space<vmem>>, %arg3: memref<1x8xf32, #tpu.memory_space<vmem>>, %arg4: memref<64x8xf32, #tpu.memory_space<vmem>>) attributes {dimension_semantics = [#tpu.dimension_semantics<arbitrary>], iteration_bounds = array<i64: 1>, scalar_prefetch = 0 : i64, scratch_operands = 0 : i64, tpu.core_type = #tpu.core_type<tc>, window_params = [{pipeline_mode = #tpu.pipeline_mode<synchronous>, transform_indices = @transform_0, window_bounds = array<i64: 64, 128>}, {pipeline_mode = #tpu.pipeline_mode<synchronous>, transform_indices = @transform_1, window_bounds = array<i64: 128, 8>}, {pipeline_mode = #tpu.pipeline_mode<synchronous>, transform_indices = @transform_2, window_bounds = array<i64: 1, 8>}, {pipeline_mode = #tpu.pipeline_mode<synchronous>, transform_indices = @transform_3, window_bounds = array<i64: 64, 8>}]} {
    %c0 = arith.constant 0 : index
    %c0_0 = arith.constant 0 : index
    %0 = vector.load %arg1[%c0, %c0_0] : memref<64x128xf32, #tpu.memory_space<vmem>>, vector<64x128xf32>
    %c0_1 = arith.constant 0 : index
    %c0_2 = arith.constant 0 : index
    %1 = vector.load %arg2[%c0_1, %c0_2] : memref<128x8xf32, #tpu.memory_space<vmem>>, vector<128x8xf32>
    %cst = arith.constant dense<0.000000e+00> : vector<64x8xf32>
    %2 = tpu.matmul %0, %1, %cst {dimension_numbers = #tpu.dot_dimension_numbers<[1], [0], [0], [1], [0, 0, 1, 1], [], []>} : vector<64x128xf32>, vector<128x8xf32>, vector<64x8xf32> -> vector<64x8xf32>
    %c0_3 = arith.constant 0 : index
    %c0_4 = arith.constant 0 : index
    %3 = vector.load %arg3[%c0_3, %c0_4] : memref<1x8xf32, #tpu.memory_space<vmem>>, vector<1x8xf32>
    %4 = vector.broadcast %3 : vector<1x8xf32> to vector<64x8xf32>
    %5 = arith.addf %2, %4 : vector<64x8xf32>
    %c0_5 = arith.constant 0 : index
    %c0_6 = arith.constant 0 : index
    %6 = vector.load %arg4[%c0_5, %c0_6] : memref<64x8xf32, #tpu.memory_space<vmem>>, vector<64x8xf32>
    tpu.vector_store %arg4[%c0_5, %c0_6], %5 {strides = array<i32>} : memref<64x8xf32, #tpu.memory_space<vmem>>, vector<64x8xf32>,
    return
  }
  func.func @transform_0(%arg0: i32) -> (i32, i32) {
    %c0_i32 = arith.constant 0 : i32
    %c0_i32_0 = arith.constant 0 : i32
    %c0_i32_1 = arith.constant 0 : i32
    return %c0_i32, %c0_i32_0 : i32, i32
  }
  func.func @transform_1(%arg0: i32) -> (i32, i32) {
    %c0_i32 = arith.constant 0 : i32
    %c0_i32_0 = arith.constant 0 : i32
    %c0_i32_1 = arith.constant 0 : i32
    return %c0_i32, %c0_i32_0 : i32, i32
  }
  func.func @transform_2(%arg0: i32) -> (i32, i32) {
    %c0_i32 = arith.constant 0 : i32
    %c0_i32_0 = arith.constant 0 : i32
    %c0_i32_1 = arith.constant 0 : i32
    return %c0_i32, %c0_i32_0 : i32, i32
  }
  func.func @transform_3(%arg0: i32) -> (i32, i32) {
    %c0_i32 = arith.constant 0 : i32
    %c0_i32_0 = arith.constant 0 : i32
    %c0_i32_1 = arith.constant 0 : i32
    return %c0_i32, %c0_i32_0 : i32, i32
  }
}

</mosaic_0001>

<bundles_post_ra>
// kernel: transformer_forward.7
= control target key start
LH: loop header
LB: loop body
LE: loop exit
PB: predicated region body
PF: predicated region fallthrough
CT: control target
= control target key end

     0   :  { %vm150_vm0 = vcmask 64512   ;;  %s407_s1 = inlined_call_operand.vmem [shape: f32[128,8], index: 1, kind: input, shape index: {}]   ;;  %s408_s0 = inlined_call_operand.vmem [shape: f32[64,128], index: 0, kind: input, shape index: {}]   ;;  %s409_s2 = inlined_call_operand.vmem [shape: f32[1,8], index: 2, kind: input, shape index: {}]   ;;  %s410_s3 = inlined_call_operand.vmem [shape: f32[64,8], index: 3, kind: output, shape index: {}]  }
   0x1   :  { %v22_v0 = vld [vmem:[%s407_s1] sm:$0xff]  ;;  %v23_v1 = vld [vmem:[%s407_s1 + $0x8] sm:$0xff]  ;;  %v24_v2 = vld [vmem:[%s407_s1 + $0x10] sm:$0xff] }
   0x2   :  { %v232_v3 = vpack.c.bf16 %v23_v1, %v22_v0  ;;  %v25_v4 = vld [vmem:[%s407_s1 + $0x18] sm:$0xff]  ;;  %v26_v6 = vld [vmem:[%s407_s1 + $0x20] sm:$0xff]  ;;  %v27_v7 = vld [vmem:[%s407_s1 + $0x28] sm:$0xff] }
   0x3   :  { %v236_v5 = vpack.c.bf16 %v25_v4, %v24_v2  ;;  %v240_v8 = vpack.c.bf16 %v27_v7, %v26_v6  ;;  %v14_v9 = vld [vmem:[%s408_s0] sm:$0xff]  ;;  %v28_v11 = vld [vmem:[%s407_s1 + $0x30] sm:$0xff]  ;;  %v29_v12 = vld [vmem:[%s407_s1 + $0x38] sm:$0xff] }
   0x4   :  { %233 = vmatprep.subr.bf16.mxu0 %v232_v3  ;;  %264 = vmatprep.subr.bf16.mxu1 %v232_v3  ;;  %v18_v10 = vld [vmem:[%s408_s0 + $0x20] sm:$0xff]  ;;  %v244_v13 = vpack.c.bf16 %v29_v12, %v28_v11  ;;  %v31_v15 = vld [vmem:[%s407_s1 + $0x48] sm:$0xff]  ;;  %v32_v17 = vld [vmem:[%s407_s1 + $0x50] sm:$0xff] }
   0x5   :  { %235 = vmatpush3.bf16.msra.mxu0 %v232_v3  ;;  %272 = vmatpush3.bf16.msra.mxu1 %v232_v3  ;;  %v30_v14 = vld [vmem:[%s407_s1 + $0x40] sm:$0xff]  ;;  %v33_v18 = vld [vmem:[%s407_s1 + $0x58] sm:$0xff]  ;;  %v35_v21 = vld [vmem:[%s407_s1 + $0x68] sm:$0xff] }
   0x6   :  { %237 = vmatprep.subr.bf16.mxu0 %v236_v5  ;;  %265 = vmatprep.subr.bf16.mxu1 %v236_v5  ;;  %v248_v16 = vpack.c.bf16 %v31_v15, %v30_v14  ;;  %v252_v19 = vpack.c.bf16 %v33_v18, %v32_v17  ;;  %v34_v20 = vld [vmem:[%s407_s1 + $0x60] sm:$0xff]  ;;  %v36_v23 = vld [vmem:[%s407_s1 + $0x70] sm:$0xff]  ;;  %v37_v24 = vld [vmem:[%s407_s1 + $0x78] sm:$0xff] }
   0x7   :  { %220 = vmatprep.mubr.f32.mxu0 %v14_v9  ;;  %226 = vmatprep.mubr.f32.mxu1 %v18_v10  ;;  %v256_v22 = vpack.c.bf16 %v35_v21, %v34_v20  ;;  %v260_v25 = vpack.c.bf16 %v37_v24, %v36_v23  ;;  %v15_v26 = vld [vmem:[%s408_s0 + $0x8] sm:$0xff]  ;;  %v16_v28 = vld [vmem:[%s408_s0 + $0x10] sm:$0xff]  ;;  %v17_v30 = vld [vmem:[%s408_s0 + $0x18] sm:$0xff] }
   0x8   :  { %v19_v27 = vld [vmem:[%s408_s0 + $0x28] sm:$0xff]  ;;  %v20_v29 = vld [vmem:[%s408_s0 + $0x30] sm:$0xff]  ;;  %v21_v31 = vld [vmem:[%s408_s0 + $0x38] sm:$0xff] }
   0x9   :  { %239 = vmatpush3.bf16.msra.mxu0 %v236_v5  ;;  %273 = vmatpush3.bf16.msra.mxu1 %v236_v5  ;;  %v163_v32 = vld [vmem:[%s409_s2] ss:$0 sm:$0xff] }
   0xa   :  { %241 = vmatprep.subr.bf16.mxu0 %v240_v8  ;;  %266 = vmatprep.subr.bf16.mxu1 %v240_v8 }
   0xd   :  { %243 = vmatpush3.bf16.msra.mxu0 %v240_v8  ;;  %274 = vmatpush3.bf16.msra.mxu1 %v240_v8 }
   0xe   :  { %245 = vmatprep.subr.bf16.mxu0 %v244_v13  ;;  %267 = vmatprep.subr.bf16.mxu1 %v244_v13 }
  0x11   :  { %247 = vmatpush3.bf16.msra.mxu0 %v244_v13  ;;  %275 = vmatpush3.bf16.msra.mxu1 %v244_v13 }
  0x12   :  { %249 = vmatprep.subr.bf16.mxu0 %v248_v16  ;;  %268 = vmatprep.subr.bf16.mxu1 %v248_v16 }
  0x15   :  { %251 = vmatpush3.bf16.msra.mxu0 %v248_v16  ;;  %276 = vmatpush3.bf16.msra.mxu1 %v248_v16 }
  0x16   :  { %253 = vmatprep.subr.bf16.mxu0 %v252_v19  ;;  %269 = vmatprep.subr.bf16.mxu1 %v252_v19 }
  0x19   :  { %255 = vmatpush3.bf16.msra.mxu0 %v252_v19  ;;  %277 = vmatpush3.bf16.msra.mxu1 %v252_v19 }
  0x1a   :  { %257 = vmatprep.subr.bf16.mxu0 %v256_v22  ;;  %270 = vmatprep.subr.bf16.mxu1 %v256_v22 }
  0x1d   :  { %259 = vmatpush3.bf16.msra.mxu0 %v256_v22  ;;  %278 = vmatpush3.bf16.msra.mxu1 %v256_v22 }
  0x1e   :  { %261 = vmatprep.subr.bf16.mxu0 %v260_v25  ;;  %271 = vmatprep.subr.bf16.mxu1 %v260_v25 }
  0x21   :  { %263 = vmatpush3.bf16.msra.mxu0 %v260_v25  ;;  %279 = vmatpush3.bf16.msra.mxu1 %v260_v25 }
  0x24   :  { %221 = vmatmul.mubr.f32.vlgmr.msra.gmra.mrb[0].mxu0 %v15_v26  ;;  %227 = vmatmul.mubr.f32.vlgmr.msra.gmra.mrb[0].mxu1 %v19_v27 }
  0x25   :  { %223 = vmatprep.mubr.f32.mxu0 %v16_v28  ;;  %229 = vmatprep.mubr.f32.mxu1 %v20_v29 }
  0x28   :  { %224 = vmatmul.mubr.f32.gmra.mrb[2].mxu0 %v17_v30  ;;  %230 = vmatmul.mubr.f32.gmra.mrb[2].mxu1 %v21_v31 }
  0xf7   :  { %v222_v33 = vpop.f32.mrb[0].mxu0  ;;  %v228_v34 = vpop.f32.mrb[0].mxu1 }
  0xf8   :  { %v117_v35 = vadd.f32 %v222_v33, %v163_v32  ;;  %v137_v36 = vadd.f32 %v228_v34, %v163_v32  ;;  %v111_v37 = vpop.f32.mrb[1].mxu0  ;;  %v131_v38 = vpop.f32.mrb[1].mxu1 }
  0xf9   :  { %v112_v39 = vadd.f32 %v163_v32, %v111_v37  ;;  %v132_v40 = vadd.f32 %v163_v32, %v131_v38 }
  0xfa   :  { %152 = vst.msk [vmem:[%s410_s3 + $0x8] sm:$0xff] %vm150_vm0, %v117_v35  ;;  %156 = vst.msk [vmem:[%s410_s3 + $0x28] sm:$0xff] %vm150_vm0, %v137_v36 }
  0xfb   :  { %151 = vst.msk [vmem:[%s410_s3] sm:$0xff] %vm150_vm0, %v112_v39  ;;  %155 = vst.msk [vmem:[%s410_s3 + $0x20] sm:$0xff] %vm150_vm0, %v132_v40  ;;  %v225_v41 = vpop.f32.mrb[2].mxu0  ;;  %v231_v42 = vpop.f32.mrb[2].mxu1 }
  0xfc   :  { %v127_v43 = vadd.f32 %v225_v41, %v163_v32  ;;  %v147_v44 = vadd.f32 %v231_v42, %v163_v32  ;;  %v121_v45 = vpop.f32.mrb[3].mxu0  ;;  %v141_v46 = vpop.f32.mrb[3].mxu1 }
  0xfd   :  { %v122_v47 = vadd.f32 %v163_v32, %v121_v45  ;;  %v142_v48 = vadd.f32 %v163_v32, %v141_v46 }
  0xfe   :  { %154 = vst.msk [vmem:[%s410_s3 + $0x18] sm:$0xff] %vm150_vm0, %v127_v43  ;;  %158 = vst.msk [vmem:[%s410_s3 + $0x38] sm:$0xff] %vm150_vm0, %v147_v44 }
  0xff   :  { %153 = vst.msk [vmem:[%s410_s3 + $0x10] sm:$0xff] %vm150_vm0, %v122_v47  ;;  %157 = vst.msk [vmem:[%s410_s3 + $0x30] sm:$0xff] %vm150_vm0, %v142_v48 }

// kernel: transformer_forward.4
= control target key start
LH: loop header
LB: loop body
LE: loop exit
PB: predicated region body
PF: predicated region fallthrough
CT: control target
= control target key end

     0   :  { %vm43_vm0 = vcmask 130048   ;;  %v175_v34 = vlaneseq  ;;  %s826_s1 = inlined_call_operand.vmem [shape: f32[16,128], index: 1, kind: input, shape index: {}]   ;;  %s827_s0 = inlined_call_operand.vmem [shape: f32[64,16], index: 0, kind: input, shape index: {}]   ;;  %s828_s2 = inlined_call_operand.vmem [shape: f32[1,128], index: 2, kind: input, shape index: {}]   ;;  %s829_s5 = inlined_call_operand.vmem [shape: f32[128,128], index: 5, kind: input, shape index: {}]   ;;  %s830_s3 = inlined_call_operand.vmem [shape: f32[1,128], index: 3, kind: input, shape index: {}]   ;;  %s831_s4 = inlined_call_operand.vmem [shape: f32[1,128], index: 4, kind: input, shape index: {}]   ;;  %s832_s6 = inlined_call_operand.vmem [shape: f32[1,128], index: 6, kind: input, shape index: {}]   ;;  %s833_s7 = inlined_call_operand.vmem [shape: f32[64,128], index: 7, kind: output, shape index: {}]  }
   0x1   :  { %v34_v0 = vld [vmem:[%s826_s1] sm:$0xff]  ;;  %v35_v1 = vld [vmem:[%s826_s1 + $0x8] sm:$0xff]  ;;  %v28_v5 = vld [vmem:[%s827_s0 + $0x10] sm:$0xff] }
   0x2   :  { %v26_v2 = vld [vmem:[%s827_s0] sm:$0xff]  ;;  %v556_v3 = vpack.c.bf16 %v35_v1, %v34_v0  ;;  %v27_v4 = vld [vmem:[%s827_s0 + $0x8] sm:$0xff]  ;;  %v29_v6 = vld [vmem:[%s827_s0 + $0x18] sm:$0xff]  ;;  %v176_v35 = vand.u32 127, %v175_v34 }
   0x3   :  { %500 = vmatprep.mubr.msk.f32.mxu0 %vm43_vm0, %v26_v2  ;;  %v30_v7 = vld [vmem:[%s827_s0 + $0x20] sm:$0xff]  ;;  %v31_v8 = vld [vmem:[%s827_s0 + $0x28] sm:$0xff]  ;;  %v32_v9 = vld [vmem:[%s827_s0 + $0x30] sm:$0xff] }
   0x4   :  { %557 = vmatprep.subr.bf16.mxu0 %v556_v3  ;;  %v33_v10 = vld [vmem:[%s827_s0 + $0x38] sm:$0xff]  ;;  %v450_v14 = vld [vmem:[%s828_s2] ss:$0 sm:$0xff]  ;;  %v311_v29 = vld [vmem:[%s829_s5 + $0x8] sm:$0xff]  ;;  %vm177_vm1 = vcmp.lt.s32.totalorder %v176_v35, 32 }
   0x5   :  { %559 = vmatpush3.bf16.msra.mxu0 %v556_v3  ;;  %v310_v28 = vld [vmem:[%s829_s5] sm:$0xff]  ;;  %v312_v30 = vld [vmem:[%s829_s5 + $0x10] sm:$0xff]  ;;  %v313_v32 = vld [vmem:[%s829_s5 + $0x18] sm:$0xff] }
   0x6   :  { %v560_v31 = vpack.c.bf16 %v311_v29, %v310_v28  ;;  %v564_v33 = vpack.c.bf16 %v313_v32, %v312_v30  ;;  %v325_v28 = vld [vmem:[%s829_s5 + $0x78] sm:$0xff] }
   0x8   :  { %501 = vmatmul.mubr.msk.f32.vlgmr.msra.gmra.mrb[0].mxu0 %vm43_vm0, %v27_v4  ;;  %592 = vmatprep.subr.bf16.mxu1 %v560_v31 }
   0x9   :  { %503 = vmatprep.mubr.msk.f32.mxu0 %vm43_vm0, %v28_v5  ;;  %561 = vmatprep.subr.bf16.mxu0 %v560_v31 }
   0xa   :  { %600 = vmatpush3.bf16.msra.mxu1 %v560_v31  ;;  %563 = vmatpush3.bf16.msra.mxu0 %v560_v31 }
   0xb   :  { %593 = vmatprep.subr.bf16.mxu1 %v564_v33  ;;  %565 = vmatprep.subr.bf16.mxu0 %v564_v33 }
   0xc   :  { %504 = vmatmul.mubr.msk.f32.gmra.mrb[2].mxu0 %vm43_vm0, %v29_v6 }
   0xd   :  { %506 = vmatprep.mubr.msk.f32.mxu0 %vm43_vm0, %v30_v7 }
   0xe   :  { %601 = vmatpush3.bf16.msra.mxu1 %v564_v33  ;;  %567 = vmatpush3.bf16.msra.mxu0 %v564_v33 }
  0x10   :  { %507 = vmatmul.mubr.msk.f32.gmra.mrb[4].mxu0 %vm43_vm0, %v31_v8 }
  0x11   :  { %509 = vmatprep.mubr.msk.f32.mxu0 %vm43_vm0, %v32_v9 }
  0x14   :  { %510 = vmatmul.mubr.msk.f32.gmra.mrb[6].mxu0 %vm43_vm0, %v33_v10 }
  0xdb   :  { %v502_v11 = vpop.f32.mrb[0].mxu0 }
  0xdc   :  { %v134_v12 = vpop.f32.mrb[1].mxu0  ;;  %v140_v26 = vadd.f32 %v502_v11, %v450_v14 }
  0xdd   :  { %v135_v24 = vadd.f32 %v450_v14, %v134_v12  ;;  %v314_v12 = vld [vmem:[%s829_s5 + $0x20] sm:$0xff] }
  0xdf   :  { %v505_v13 = vpop.f32.mrb[2].mxu0 }
  0xe0   :  { %v144_v15 = vpop.f32.mrb[3].mxu0  ;;  %v150_v20 = vadd.f32 %v505_v13, %v450_v14  ;;  %v315_v13 = vld [vmem:[%s829_s5 + $0x28] sm:$0xff] }
  0xe1   :  { %v145_v16 = vadd.f32 %v450_v14, %v144_v15  ;;  %v316_v15 = vld [vmem:[%s829_s5 + $0x30] sm:$0xff] }
  0xe3   :  { %v508_v17 = vpop.f32.mrb[4].mxu0  ;;  %182 = vadd.xlane.f32.xlu0 %v145_v16 }
  0xe4   :  { %v160_v18 = vadd.f32 %v508_v17, %v450_v14  ;;  %v154_v19 = vpop.f32.mrb[5].mxu0 }
  0xe5   :  { %v155_v22 = vadd.f32 %v450_v14, %v154_v19  ;;  %v319_v19 = vld [vmem:[%s829_s5 + $0x48] sm:$0xff] }
  0xe6   :  { %188 = vadd.xlane.f32.xlu1 %v160_v18 }
  0xe7   :  { %184 = vadd.xlane.f32.xlu0 %v150_v20  ;;  %v511_v21 = vpop.f32.mrb[6].mxu0 }
  0xe8   :  { %v164_v23 = vpop.f32.mrb[7].mxu0  ;;  %v170_v27 = vadd.f32 %v511_v21, %v450_v14  ;;  %v320_v21 = vld [vmem:[%s829_s5 + $0x50] sm:$0xff] }
  0xe9   :  { %v165_v25 = vadd.f32 %v450_v14, %v164_v23  ;;  %v568_v14 = vpack.c.bf16 %v315_v13, %v314_v12 }
  0xea   :  { %186 = vadd.xlane.f32.xlu1 %v155_v22 }
  0xeb   :  { %178 = vadd.xlane.f32.xlu0 %v135_v24  ;;  %594 = vmatprep.subr.bf16.mxu1 %v568_v14 }
  0xec   :  { %569 = vmatprep.subr.bf16.mxu0 %v568_v14  ;;  %602 = vmatpush3.bf16.msra.mxu1 %v568_v14 }
  0xed   :  { %571 = vmatpush3.bf16.msra.mxu0 %v568_v14 }
  0xee   :  { %190 = vadd.xlane.f32.xlu1 %v165_v25 }
  0xef   :  { %180 = vadd.xlane.f32.xlu0 %v140_v26 }
  0xf2   :  { %192 = vadd.xlane.f32.xlu1 %v170_v27 }
 0x170   :  { %v183_v36 = vpop.xlane.xlu0 %182 }
 0x171   :  { %v196_v37 = vmul.f32 0.03125, %v183_v36 }
 0x173   :  { %v717_v38 = vsub.f32 %v145_v16, %v196_v37  ;;  %v189_v39 = vpop.xlane.xlu1 %188  ;;  %v317_v16 = vld [vmem:[%s829_s5 + $0x38] sm:$0xff] }
 0x174   :  { %v199_v40 = vmul.f32 0.03125, %v189_v39  ;;  %v185_v41 = vpop.xlane.xlu0 %184  ;;  %v572_v17 = vpack.c.bf16 %v317_v16, %v316_v15 }
 0x175   :  { %v197_v42 = vmul.f32 0.03125, %v185_v41  ;;  %v212_v43 = vsel %vm177_vm1, %v717_v38, 0.0 }
 0x176   :  { %v220_v44 = vmul.f32 %v212_v43, %v212_v43  ;;  %v721_v45 = vsub.f32 %v160_v18, %v199_v40  ;;  %595 = vmatprep.subr.bf16.mxu1 %v572_v17  ;;  %573 = vmatprep.subr.bf16.mxu0 %v572_v17  ;;  %v318_v18 = vld [vmem:[%s829_s5 + $0x40] sm:$0xff] }
 0x177   :  { %v723_v46 = vsub.f32 %v150_v20, %v197_v42  ;;  %v187_v47 = vpop.xlane.xlu1 %186  ;;  %603 = vmatpush3.bf16.msra.mxu1 %v572_v17  ;;  %575 = vmatpush3.bf16.msra.mxu0 %v572_v17  ;;  %v576_v20 = vpack.c.bf16 %v319_v19, %v318_v18 }
 0x178   :  { %v198_v48 = vmul.f32 0.03125, %v187_v47  ;;  %230 = vadd.xlane.f32.xlu0 %v220_v44  ;;  %v179_v49 = vpop.xlane.xlu0 %178  ;;  %v215_v56 = vsel %vm177_vm1, %v721_v45, 0.0 }
 0x179   :  { %v194_v50 = vmul.f32 0.03125, %v179_v49  ;;  %v213_v51 = vsel %vm177_vm1, %v723_v46, 0.0  ;;  %v223_v63 = vmul.f32 %v215_v56, %v215_v56  ;;  %596 = vmatprep.subr.bf16.mxu1 %v576_v20  ;;  %577 = vmatprep.subr.bf16.mxu0 %v576_v20 }
 0x17a   :  { %v727_v52 = vsub.f32 %v155_v22, %v198_v48  ;;  %v221_v53 = vmul.f32 %v213_v51, %v213_v51  ;;  %v321_v22 = vld [vmem:[%s829_s5 + $0x58] sm:$0xff] }
 0x17b   :  { %v729_v54 = vsub.f32 %v135_v24, %v194_v50  ;;  %v191_v55 = vpop.xlane.xlu1 %190  ;;  %604 = vmatpush3.bf16.msra.mxu1 %v576_v20  ;;  %579 = vmatpush3.bf16.msra.mxu0 %v576_v20  ;;  %v580_v23 = vpack.c.bf16 %v321_v22, %v320_v21  ;;  %v322_v24 = vld [vmem:[%s829_s5 + $0x60] sm:$0xff] }
 0x17c   :  { %v200_v57 = vmul.f32 0.03125, %v191_v55  ;;  %232 = vadd.xlane.f32.xlu1 %v221_v53  ;;  %v181_v58 = vpop.xlane.xlu0 %180  ;;  %v214_v59 = vsel %vm177_vm1, %v727_v52, 0.0  ;;  %v459_v53 = vld [vmem:[%s830_s3] ss:$0 sm:$0xff] }
 0x17d   :  { %v195_v60 = vmul.f32 0.03125, %v181_v58  ;;  %v222_v61 = vmul.f32 %v214_v59, %v214_v59  ;;  %v210_v0 = vsel %vm177_vm1, %v729_v54, 0.0  ;;  %597 = vmatprep.subr.bf16.mxu1 %v580_v23  ;;  %581 = vmatprep.subr.bf16.mxu0 %v580_v23 }
 0x17e   :  { %v735_v62 = vsub.f32 %v165_v25, %v200_v57  ;;  %v218_v5 = vmul.f32 %v210_v0, %v210_v0  ;;  %v323_v25 = vld [vmem:[%s829_s5 + $0x68] sm:$0xff] }
 0x17f   :  { %v739_v1 = vsub.f32 %v140_v26, %v195_v60  ;;  %v193_v2 = vpop.xlane.xlu1 %192  ;;  %234 = vadd.xlane.f32.xlu0 %v222_v61  ;;  %605 = vmatpush3.bf16.msra.mxu1 %v580_v23  ;;  %v584_v26 = vpack.c.bf16 %v323_v25, %v322_v24  ;;  %v460_v60 = vld [vmem:[%s831_s4] ss:$0 sm:$0xff] }
 0x180   :  { %v201_v3 = vmul.f32 0.03125, %v193_v2  ;;  %236 = vadd.xlane.f32.xlu1 %v223_v63  ;;  %v216_v4 = vsel %vm177_vm1, %v735_v62, 0.0  ;;  %583 = vmatpush3.bf16.msra.mxu0 %v580_v23 }
 0x181   :  { %v224_v6 = vmul.f32 %v216_v4, %v216_v4  ;;  %v211_v8 = vsel %vm177_vm1, %v739_v1, 0.0  ;;  %598 = vmatprep.subr.bf16.mxu1 %v584_v26  ;;  %585 = vmatprep.subr.bf16.mxu0 %v584_v26 }
 0x182   :  { %v743_v7 = vsub.f32 %v170_v27, %v201_v3  ;;  %v219_v10 = vmul.f32 %v211_v8, %v211_v8  ;;  %v324_v27 = vld [vmem:[%s829_s5 + $0x70] sm:$0xff] }
 0x183   :  { %226 = vadd.xlane.f32.xlu0 %v218_v5  ;;  %606 = vmatpush3.bf16.msra.mxu1 %v584_v26  ;;  %v588_v29 = vpack.c.bf16 %v325_v28, %v324_v27 }
 0x184   :  { %238 = vadd.xlane.f32.xlu1 %v224_v6  ;;  %v217_v9 = vsel %vm177_vm1, %v743_v7, 0.0  ;;  %587 = vmatpush3.bf16.msra.mxu0 %v584_v26 }
 0x185   :  { %v225_v11 = vmul.f32 %v217_v9, %v217_v9  ;;  %599 = vmatprep.subr.bf16.mxu1 %v588_v29  ;;  %589 = vmatprep.subr.bf16.mxu0 %v588_v29 }
 0x187   :  { %228 = vadd.xlane.f32.xlu0 %v219_v10  ;;  %607 = vmatpush3.bf16.msra.mxu1 %v588_v29 }
 0x188   :  { %240 = vadd.xlane.f32.xlu1 %v225_v11  ;;  %591 = vmatpush3.bf16.msra.mxu0 %v588_v29 }
 0x205   :  { %v231_v30 = vpop.xlane.xlu0 %230 }
 0x206   :  { %v244_v31 = vmul.f32 0.03125, %v231_v30 }
 0x208   :  { %v252_v32 = vadd.f32 1e-05, %v244_v31 }
 0x209   :  { %v233_v33 = vpop.xlane.xlu1 %232 }
 0x20a   :  { %608 = vrsqrt.f32 %v252_v32  ;;  %v245_v34 = vmul.f32 0.03125, %v233_v33 }
 0x20c   :  { %v253_v35 = vadd.f32 1e-05, %v245_v34  ;;  %v235_v36 = vpop.xlane.xlu0 %234 }
 0x20d   :  { %v246_v37 = vmul.f32 0.03125, %v235_v36  ;;  %v237_v39 = vpop.xlane.xlu1 %236 }
 0x20e   :  { %610 = vrsqrt.f32 %v253_v35  ;;  %v247_v40 = vmul.f32 0.03125, %v237_v39 }
 0x20f   :  { %v254_v41 = vadd.f32 1e-05, %v246_v37 }
 0x210   :  { %v255_v42 = vadd.f32 1e-05, %v247_v40  ;;  %v227_v43 = vpop.xlane.xlu0 %226 }
 0x211   :  { %612 = vrsqrt.f32 %v254_v41  ;;  %v242_v44 = vmul.f32 0.03125, %v227_v43  ;;  %v239_v47 = vpop.xlane.xlu1 %238 }
 0x212   :  { %614 = vrsqrt.f32 %v255_v42  ;;  %v248_v48 = vmul.f32 0.03125, %v239_v47 }
 0x213   :  { %v250_v49 = vadd.f32 1e-05, %v242_v44 }
 0x214   :  { %v609_v50 = vpop.eup %608  ;;  %v256_v51 = vadd.f32 1e-05, %v248_v48  ;;  %v229_v55 = vpop.xlane.xlu0 %228 }
 0x215   :  { %616 = vrsqrt.f32 %v250_v49  ;;  %v243_v56 = vmul.f32 0.03125, %v229_v55  ;;  %v241_v57 = vpop.xlane.xlu1 %240  ;;  %v268_v58 = vmul.f32 %v609_v50, %v717_v38 }
 0x216   :  { %618 = vrsqrt.f32 %v256_v51  ;;  %v249_v59 = vmul.f32 0.03125, %v241_v57 }
 0x217   :  { %v251_v61 = vadd.f32 1e-05, %v243_v56  ;;  %v282_v63 = vmul.f32 %v459_v53, %v268_v58 }
 0x218   :  { %v611_v0 = vpop.eup %610  ;;  %v257_v2 = vadd.f32 1e-05, %v249_v59 }
 0x219   :  { %620 = vrsqrt.f32 %v251_v61  ;;  %v296_v3 = vadd.f32 %v460_v60, %v282_v63  ;;  %v269_v4 = vmul.f32 %v611_v0, %v723_v46 }
 0x21a   :  { %622 = vrsqrt.f32 %v257_v2 }
 0x21b   :  { %v613_v5 = vpop.eup %612  ;;  %v304_v6 = vmax.f32 %v296_v3, 0.0  ;;  %v283_v8 = vmul.f32 %v459_v53, %v269_v4 }
 0x21c   :  { %v615_v9 = vpop.eup %614  ;;  %v270_v38 = vmul.f32 %v613_v5, %v727_v52 }
 0x21d   :  { %547 = vmatprep.mubr.f32.mxu1 %v304_v6  ;;  %v297_v10 = vadd.f32 %v460_v60, %v283_v8  ;;  %v271_v11 = vmul.f32 %v615_v9, %v721_v45 }
 0x21e   :  { %v284_v12 = vmul.f32 %v459_v53, %v270_v38 }
 0x21f   :  { %v617_v13 = vpop.eup %616  ;;  %v305_v14 = vmax.f32 %v297_v10, 0.0  ;;  %v285_v15 = vmul.f32 %v459_v53, %v271_v11 }
 0x220   :  { %v619_v16 = vpop.eup %618  ;;  %v298_v17 = vadd.f32 %v460_v60, %v284_v12  ;;  %v266_v18 = vmul.f32 %v617_v13, %v729_v54 }
 0x221   :  { %548 = vmatmul.mubr.f32.vlgmr.msra.gmra.mrb[0].mxu1 %v305_v14  ;;  %v299_v46 = vadd.f32 %v460_v60, %v285_v15  ;;  %v272_v19 = vmul.f32 %v619_v16, %v735_v62 }
 0x222   :  { %v306_v20 = vmax.f32 %v298_v17, 0.0  ;;  %v280_v21 = vmul.f32 %v459_v53, %v266_v18 }
 0x223   :  { %v621_v22 = vpop.eup %620  ;;  %v307_v52 = vmax.f32 %v299_v46, 0.0  ;;  %v286_v23 = vmul.f32 %v459_v53, %v272_v19 }
 0x224   :  { %v623_v24 = vpop.eup %622  ;;  %v267_v45 = vmul.f32 %v621_v22, %v739_v1  ;;  %550 = vmatprep.mubr.f32.mxu1 %v306_v20  ;;  %v294_v25 = vadd.f32 %v460_v60, %v280_v21  ;;  %v461_v1 = vld [vmem:[%s832_s6] ss:$0 sm:$0xff] }
 0x225   :  { %551 = vmatmul.mubr.f32.gmra.mrb[2].mxu1 %v307_v52  ;;  %v300_v26 = vadd.f32 %v460_v60, %v286_v23  ;;  %v273_v27 = vmul.f32 %v623_v24, %v743_v7 }
 0x226   :  { %v281_v28 = vmul.f32 %v459_v53, %v267_v45  ;;  %v302_v54 = vmax.f32 %v294_v25, 0.0 }
 0x227   :  { %v308_v29 = vmax.f32 %v300_v26, 0.0  ;;  %v287_v30 = vmul.f32 %v459_v53, %v273_v27 }
 0x228   :  { %544 = vmatprep.mubr.f32.mxu0 %v302_v54  ;;  %v295_v62 = vadd.f32 %v460_v60, %v281_v28 }
 0x229   :  { %553 = vmatprep.mubr.f32.mxu1 %v308_v29  ;;  %v301_v31 = vadd.f32 %v460_v60, %v287_v30 }
 0x22a   :  { %v303_v32 = vmax.f32 %v295_v62, 0.0 }
 0x22b   :  { %v309_v33 = vmax.f32 %v301_v31, 0.0 }
 0x22c   :  { %545 = vmatmul.mubr.f32.vlgmr.msra.gmra.mrb[8].mxu0 %v303_v32 }
 0x22d   :  { %554 = vmatmul.mubr.f32.gmra.mrb[4].mxu1 %v309_v33 }
 0x2f4   :  { %v549_v34 = vpop.f32.mrb[0].mxu1 }
 0x2f5   :  { %v415_v35 = vadd.f32 %v549_v34, %v461_v1  ;;  %v409_v36 = vpop.f32.mrb[1].mxu1 }
 0x2f6   :  { %v410_v7 = vadd.f32 %v461_v1, %v409_v36 }
 0x2f7   :  { %441 = vst [vmem:[%s833_s7 + $0x18] sm:$0xff] %v415_v35 }
 0x2f8   :  { %440 = vst [vmem:[%s833_s7 + $0x10] sm:$0xff] %v410_v7  ;;  %v552_v37 = vpop.f32.mrb[2].mxu1 }
 0x2f9   :  { %v425_v39 = vadd.f32 %v552_v37, %v461_v1  ;;  %v419_v40 = vpop.f32.mrb[3].mxu1 }
 0x2fa   :  { %v420_v41 = vadd.f32 %v461_v1, %v419_v40 }
 0x2fb   :  { %443 = vst [vmem:[%s833_s7 + $0x28] sm:$0xff] %v425_v39 }
 0x2fc   :  { %442 = vst [vmem:[%s833_s7 + $0x20] sm:$0xff] %v420_v41 }
 0x2ff   :  { %v546_v42 = vpop.f32.mrb[8].mxu0 }
 0x300   :  { %v405_v43 = vadd.f32 %v546_v42, %v461_v1  ;;  %v399_v44 = vpop.f32.mrb[9].mxu0  ;;  %v555_v47 = vpop.f32.mrb[4].mxu1 }
 0x301   :  { %v400_v48 = vadd.f32 %v461_v1, %v399_v44  ;;  %v435_v49 = vadd.f32 %v555_v47, %v461_v1  ;;  %v429_v50 = vpop.f32.mrb[5].mxu1 }
 0x302   :  { %439 = vst [vmem:[%s833_s7 + $0x8] sm:$0xff] %v405_v43  ;;  %v430_v51 = vadd.f32 %v461_v1, %v429_v50 }
 0x303   :  { %438 = vst [vmem:[%s833_s7] sm:$0xff] %v400_v48  ;;  %445 = vst [vmem:[%s833_s7 + $0x38] sm:$0xff] %v435_v49 }
 0x304   :  { %444 = vst [vmem:[%s833_s7 + $0x30] sm:$0xff] %v430_v51 }

// kernel: transformer_forward.5
= control target key start
LH: loop header
LB: loop body
LE: loop exit
PB: predicated region body
PF: predicated region fallthrough
CT: control target
= control target key end

     0   :  { %vm461_vm0 = vcmask 261120   ;;  %vm615_vm2 = vcmask 523264   ;;  %s2784_s25 = smov 32   ;;  %vm1291_vm3 = vcmask 523520   ;;  %s3624_s4 = inlined_call_operand.vmem [shape: f32[128,64], index: 4, kind: input, shape index: {}]   ;;  %s3625_s0 = inlined_call_operand.vmem [shape: f32[64,128], index: 0, kind: input, shape index: {}]   ;;  %s3626_s1 = inlined_call_operand.vmem [shape: f32[64,128], index: 1, kind: input, shape index: {}]   ;;  %s3627_s2 = inlined_call_operand.vmem [shape: f32[128,64], index: 2, kind: input, shape index: {}]   ;;  %s3628_s5 = inlined_call_operand.vmem [shape: f32[1,64], index: 5, kind: input, shape index: {}]   ;;  %s3629_s3 = inlined_call_operand.vmem [shape: f32[1,64], index: 3, kind: input, shape index: {}]   ;;  %s3630_s6 = inlined_call_operand.vmem [shape: f32[128,64], index: 6, kind: input, shape index: {}]   ;;  %s3631_s7 = inlined_call_operand.vmem [shape: f32[1,64], index: 7, kind: input, shape index: {}]   ;;  %s3632_s8 = inlined_call_operand.vmem [shape: f32[64,128], index: 8, kind: input, shape index: {}]   ;;  %s3633_s9 = inlined_call_operand.vmem [shape: f32[1,128], index: 9, kind: input, shape index: {}]   ;;  %s3634_s12 = inlined_call_operand.vmem [shape: f32[128,128], index: 12, kind: input, shape index: {}]   ;;  %s3635_s10 = inlined_call_operand.vmem [shape: f32[1,128], index: 10, kind: input, shape index: {}]   ;;  %s3636_s11 = inlined_call_operand.vmem [shape: f32[1,128], index: 11, kind: input, shape index: {}]   ;;  %s3637_s13 = inlined_call_operand.vmem [shape: f32[1,128], index: 13, kind: input, shape index: {}]   ;;  %s3638_s14 = inlined_call_operand.vmem [shape: f32[1,128], index: 14, kind: input, shape index: {}]   ;;  %s3639_s15 = inlined_call_operand.vmem [shape: f32[1,128], index: 15, kind: input, shape index: {}]   ;;  %s3640_s16 = inlined_call_operand.vmem [shape: f32[64,128], index: 16, kind: output, shape index: {}]  }
   0x1   :  { %3642 = sst [smem:[#allocation3_spill]] %s3624_s4  ;;  %v2891_v9 = vld [vmem:[%s3625_s0] sm:$0xff]  ;;  %v78_v15 = vld [vmem:[%s3627_s2 + $0x8] sm:$0xff]  ;;  %v79_v16 = vld [vmem:[%s3627_s2 + $0x10] sm:$0xff] }
   0x2   :  { %s3643_s23 = sld [smem:[#allocation3_spill]]  ;;  %v61_v10 = vld [vmem:[%s3626_s1] sm:$0xff]  ;;  %v80_v17 = vld [vmem:[%s3627_s2 + $0x18] sm:$0xff]  ;;  %v82_v22 = vld [vmem:[%s3627_s2 + $0x28] sm:$0xff] }
   0x3   :  { %v69_v13 = vadd.f32 %v61_v10, %v2891_v9  ;;  %v77_v14 = vld [vmem:[%s3627_s2] sm:$0xff]  ;;  %v2425_v19 = vpack.c.bf16 %v80_v17, %v79_v16  ;;  %v83_v27 = vld [vmem:[%s3627_s2 + $0x30] sm:$0xff]  ;;  %v84_v28 = vld [vmem:[%s3627_s2 + $0x38] sm:$0xff] }
   0x4   :  { %v2421_v18 = vpack.c.bf16 %v78_v15, %v77_v14  ;;  %v81_v21 = vld [vmem:[%s3627_s2 + $0x20] sm:$0xff]  ;;  %v2433_v31 = vpack.c.bf16 %v84_v28, %v83_v27  ;;  %v86_v34 = vld [vmem:[%s3627_s2 + $0x48] sm:$0xff]  ;;  %v87_v39 = vld [vmem:[%s3627_s2 + $0x50] sm:$0xff] }
   0x5   :  { %2181 = vmatprep.mubr.f32.mxu1 %v69_v13  ;;  %2137 = vmatprep.mubr.f32.mxu0 %v69_v13  ;;  %v2429_v25 = vpack.c.bf16 %v82_v22, %v81_v21  ;;  %v85_v33 = vld [vmem:[%s3627_s2 + $0x40] sm:$0xff]  ;;  %v88_v40 = vld [vmem:[%s3627_s2 + $0x58] sm:$0xff]  ;;  %v90_v46 = vld [vmem:[%s3627_s2 + $0x68] sm:$0xff] }
   0x6   :  { %2422 = vmatprep.subr.bf16.mxu0 %v2421_v18  ;;  %v2437_v37 = vpack.c.bf16 %v86_v34, %v85_v33  ;;  %v2441_v43 = vpack.c.bf16 %v88_v40, %v87_v39  ;;  %v89_v45 = vld [vmem:[%s3627_s2 + $0x60] sm:$0xff]  ;;  %v2972_v47 = vld [vmem:[%s3625_s0 + $0x8] sm:$0xff]  ;;  %v2980_v49 = vld [vmem:[%s3625_s0 + $0x10] sm:$0xff] }
   0x7   :  { %2424 = vmatpush3.bf16.msra.mxu0 %v2421_v18  ;;  %v62_v48 = vld [vmem:[%s3626_s1 + $0x8] sm:$0xff]  ;;  %v2445_v50 = vpack.c.bf16 %v90_v46, %v89_v45  ;;  %v63_v51 = vld [vmem:[%s3626_s1 + $0x10] sm:$0xff]  ;;  %v92_v53 = vld [vmem:[%s3627_s2 + $0x78] sm:$0xff] }
   0x8   :  { %v205_v0 = vld [vmem:[%s3643_s23] sm:$0xff]  ;;  %v206_v1 = vld [vmem:[%s3643_s23 + $0x8] sm:$0xff]  ;;  %v207_v2 = vld [vmem:[%s3643_s23 + $0x10] sm:$0xff]  ;;  %2426 = vmatprep.subr.bf16.mxu0 %v2425_v19  ;;  %v70_v54 = vadd.f32 %v62_v48, %v2972_v47  ;;  %v71_v55 = vadd.f32 %v63_v51, %v2980_v49 }
   0x9   :  { %v2453_v3 = vpack.c.bf16 %v206_v1, %v205_v0  ;;  %v208_v4 = vld [vmem:[%s3643_s23 + $0x18] sm:$0xff]  ;;  %v209_v6 = vld [vmem:[%s3643_s23 + $0x20] sm:$0xff]  ;;  %v210_v7 = vld [vmem:[%s3643_s23 + $0x28] sm:$0xff] }
   0xa   :  { %v2457_v5 = vpack.c.bf16 %v208_v4, %v207_v2  ;;  %v2461_v8 = vpack.c.bf16 %v210_v7, %v209_v6  ;;  %v211_v11 = vld [vmem:[%s3643_s23 + $0x30] sm:$0xff]  ;;  %v212_v12 = vld [vmem:[%s3643_s23 + $0x38] sm:$0xff]  ;;  %v213_v23 = vld [vmem:[%s3643_s23 + $0x40] sm:$0xff] }
   0xb   :  { %2454 = vmatprep.subr.bf16.mxu1 %v2453_v3  ;;  %v2465_v20 = vpack.c.bf16 %v212_v12, %v211_v11  ;;  %v214_v24 = vld [vmem:[%s3643_s23 + $0x48] sm:$0xff]  ;;  %v215_v29 = vld [vmem:[%s3643_s23 + $0x50] sm:$0xff]  ;;  %v216_v30 = vld [vmem:[%s3643_s23 + $0x58] sm:$0xff]  ;;  %2428 = vmatpush3.bf16.msra.mxu0 %v2425_v19 }
   0xc   :  { %2456 = vmatpush3.bf16.msra.mxu1 %v2453_v3  ;;  %v2469_v26 = vpack.c.bf16 %v214_v24, %v213_v23  ;;  %2430 = vmatprep.subr.bf16.mxu0 %v2429_v25  ;;  %v2473_v32 = vpack.c.bf16 %v216_v30, %v215_v29  ;;  %v217_v35 = vld [vmem:[%s3643_s23 + $0x60] sm:$0xff]  ;;  %v218_v36 = vld [vmem:[%s3643_s23 + $0x68] sm:$0xff]  ;;  %v219_v41 = vld [vmem:[%s3643_s23 + $0x70] sm:$0xff] }
   0xd   :  { %2458 = vmatprep.subr.bf16.mxu1 %v2457_v5  ;;  %v2477_v38 = vpack.c.bf16 %v218_v36, %v217_v35  ;;  %v220_v42 = vld [vmem:[%s3643_s23 + $0x78] sm:$0xff]  ;;  %v91_v52 = vld [vmem:[%s3627_s2 + $0x70] sm:$0xff]  ;;  %v3004_v59 = vld [vmem:[%s3625_s0 + $0x20] sm:$0xff] }
   0xe   :  { %v2481_v44 = vpack.c.bf16 %v220_v42, %v219_v41  ;;  %v2996_v56 = vld [vmem:[%s3625_s0 + $0x18] sm:$0xff]  ;;  %v2449_v58 = vpack.c.bf16 %v92_v53, %v91_v52  ;;  %v65_v60 = vld [vmem:[%s3626_s1 + $0x20] sm:$0xff]  ;;  %v3014_v63 = vld [vmem:[%s3625_s0 + $0x28] sm:$0xff] }
   0xf   :  { %2432 = vmatpush3.bf16.msra.mxu0 %v2429_v25  ;;  %v64_v57 = vld [vmem:[%s3626_s1 + $0x18] sm:$0xff]  ;;  %v73_v62 = vadd.f32 %v65_v60, %v3004_v59  ;;  %v66_v0 = vld [vmem:[%s3626_s1 + $0x28] sm:$0xff]  ;;  %v3022_v1 = vld [vmem:[%s3625_s0 + $0x30] sm:$0xff] }
  0x10   :  { %2460 = vmatpush3.bf16.msra.mxu1 %v2457_v5  ;;  %2434 = vmatprep.subr.bf16.mxu0 %v2433_v31  ;;  %v72_v61 = vadd.f32 %v64_v57, %v2996_v56  ;;  %v67_v2 = vld [vmem:[%s3626_s1 + $0x30] sm:$0xff]  ;;  %v74_v3 = vadd.f32 %v66_v0, %v3014_v63  ;;  %v3032_v5 = vld [vmem:[%s3625_s0 + $0x38] sm:$0xff]  ;;  %vm3044_vm1 = vmpackc.low %vm461_vm0, %vm461_vm0 }
  0x11   :  { %2462 = vmatprep.subr.bf16.mxu1 %v2461_v8  ;;  %v75_v4 = vadd.f32 %v67_v2, %v3022_v1  ;;  %v68_v6 = vld [vmem:[%s3626_s1 + $0x38] sm:$0xff]  ;;  %s2783_s1 = smov 96   ;;  %v333_v48 = vld [vmem:[%s3630_s6] sm:$0xff]  ;;  %v335_v52 = vld [vmem:[%s3630_s6 + $0x10] sm:$0xff] }
  0x12   :  { %v76_v7 = vadd.f32 %v68_v6, %v3032_v5  ;;  %v336_v53 = vld [vmem:[%s3630_s6 + $0x18] sm:$0xff]  ;;  %v337_v60 = vld [vmem:[%s3630_s6 + $0x20] sm:$0xff]  ;;  %v339_v2 = vld [vmem:[%s3630_s6 + $0x30] sm:$0xff] }
  0x13   :  { %2436 = vmatpush3.bf16.msra.mxu0 %v2433_v31  ;;  %v341_v6 = vld [vmem:[%s3630_s6 + $0x40] sm:$0xff] }
  0x14   :  { %2464 = vmatpush3.bf16.msra.mxu1 %v2461_v8  ;;  %2438 = vmatprep.subr.bf16.mxu0 %v2437_v37  ;;  %v1865_v8 = vld [vmem:[%s3628_s5] ss:$0 sm:$0xff] }
  0x15   :  { %2466 = vmatprep.subr.bf16.mxu1 %v2465_v20 }
  0x17   :  { %2440 = vmatpush3.bf16.msra.mxu0 %v2437_v37 }
  0x18   :  { %2468 = vmatpush3.bf16.msra.mxu1 %v2465_v20  ;;  %2442 = vmatprep.subr.bf16.mxu0 %v2441_v43  ;;  %v3054_v20 = vld [vmem:[%s3629_s3] ss:$0 sm:$0xff] }
  0x19   :  { %2470 = vmatprep.subr.bf16.mxu1 %v2469_v26 }
  0x1b   :  { %2444 = vmatpush3.bf16.msra.mxu0 %v2441_v43 }
  0x1c   :  { %2472 = vmatpush3.bf16.msra.mxu1 %v2469_v26  ;;  %2446 = vmatprep.subr.bf16.mxu0 %v2445_v50 }
  0x1d   :  { %2474 = vmatprep.subr.bf16.mxu1 %v2473_v32 }
  0x1f   :  { %2448 = vmatpush3.bf16.msra.mxu0 %v2445_v50  ;;  %v334_v50 = vld [vmem:[%s3630_s6 + $0x8] sm:$0xff] }
  0x20   :  { %2476 = vmatpush3.bf16.msra.mxu1 %v2473_v32  ;;  %2450 = vmatprep.subr.bf16.mxu0 %v2449_v58  ;;  %v2485_v51 = vpack.c.bf16 %v334_v50, %v333_v48 }
  0x21   :  { %2478 = vmatprep.subr.bf16.mxu1 %v2477_v38 }
  0x23   :  { %2452 = vmatpush3.bf16.msra.mxu0 %v2449_v58 }
  0x24   :  { %2480 = vmatpush3.bf16.msra.mxu1 %v2477_v38  ;;  %2486 = vmatprep.subr.bf16.mxu0 %v2485_v51 }
  0x25   :  { %2482 = vmatprep.subr.bf16.mxu1 %v2481_v44 }
  0x26   :  { %2138 = vmatmul.mubr.f32.vlgmr.msra.gmra.mrb[0].mxu0 %v70_v54 }
  0x27   :  { %2140 = vmatprep.mubr.f32.mxu0 %v71_v55  ;;  %2488 = vmatpush3.bf16.msra.mxu0 %v2485_v51 }
  0x28   :  { %2484 = vmatpush3.bf16.msra.mxu1 %v2481_v44 }
  0x2a   :  { %2141 = vmatmul.mubr.f32.gmra.mrb[2].mxu0 %v72_v61 }
  0x2b   :  { %2182 = vmatmul.mubr.f32.vlgmr.msra.gmra.mrb[0].mxu1 %v70_v54  ;;  %2143 = vmatprep.mubr.f32.mxu0 %v73_v62  ;;  %v2489_v54 = vpack.c.bf16 %v336_v53, %v335_v52 }
  0x2c   :  { %2184 = vmatprep.mubr.f32.mxu1 %v71_v55 }
  0x2d   :  { %2490 = vmatprep.subr.bf16.mxu0 %v2489_v54 }
  0x2e   :  { %2144 = vmatmul.mubr.f32.gmra.mrb[4].mxu0 %v74_v3 }
  0x2f   :  { %2185 = vmatmul.mubr.f32.gmra.mrb[2].mxu1 %v72_v61  ;;  %2146 = vmatprep.mubr.f32.mxu0 %v75_v4  ;;  %v338_v61 = vld [vmem:[%s3630_s6 + $0x28] sm:$0xff] }
  0x30   :  { %2187 = vmatprep.mubr.f32.mxu1 %v73_v62  ;;  %2492 = vmatpush3.bf16.msra.mxu0 %v2489_v54  ;;  %v2493_v62 = vpack.c.bf16 %v338_v61, %v337_v60  ;;  %v3199_v54 = vld [vmem:[%s3631_s7] ss:$0 sm:$0xff] }
  0x32   :  { %2147 = vmatmul.mubr.f32.gmra.mrb[6].mxu0 %v76_v7  ;;  %2494 = vmatprep.subr.bf16.mxu0 %v2493_v62 }
  0x33   :  { %2188 = vmatmul.mubr.f32.gmra.mrb[4].mxu1 %v74_v3  ;;  %2225 = vmatprep.mubr.f32.mxu0 %v2891_v9  ;;  %v340_v3 = vld [vmem:[%s3630_s6 + $0x38] sm:$0xff] }
  0x34   :  { %2190 = vmatprep.mubr.f32.mxu1 %v75_v4  ;;  %2496 = vmatpush3.bf16.msra.mxu0 %v2493_v62  ;;  %v2497_v4 = vpack.c.bf16 %v340_v3, %v339_v2 }
  0x36   :  { %2498 = vmatprep.subr.bf16.mxu0 %v2497_v4 }
  0x37   :  { %2191 = vmatmul.mubr.f32.gmra.mrb[6].mxu1 %v76_v7  ;;  %v342_v7 = vld [vmem:[%s3630_s6 + $0x48] sm:$0xff] }
  0x38   :  { %2500 = vmatpush3.bf16.msra.mxu0 %v2497_v4 }
  0xf9   :  { %v2139_v21 = vpop.f32.mrb[0].mxu0 }
  0xfa   :  { %v166_v25 = vpop.f32.mrb[1].mxu0  ;;  %v172_v44 = vadd.f32 %v2139_v21, %v3054_v20 }
  0xfb   :  { %v167_v28 = vadd.f32 %v3054_v20, %v166_v25 }
  0xfd   :  { %v2142_v30 = vpop.f32.mrb[2].mxu0  ;;  %2253 = vmatprep.mubr.msk.f32.mxu1 %vm461_vm0, %v167_v28 }
  0xfe   :  { %v2183_v10 = vpop.f32.mrb[0].mxu1  ;;  %v176_v34 = vpop.f32.mrb[3].mxu0  ;;  %v182_v55 = vadd.f32 %v2142_v30, %v3054_v20 }
  0xff   :  { %v300_v11 = vadd.f32 %v2183_v10, %v1865_v8  ;;  %v294_v12 = vpop.f32.mrb[1].mxu1  ;;  %v177_v41 = vadd.f32 %v3054_v20, %v176_v34  ;;  %v343_v10 = vld [vmem:[%s3630_s6 + $0x50] sm:$0xff] }
 0x100   :  { %v295_v13 = vadd.f32 %v1865_v8, %v294_v12 }
 0x101   :  { %v2145_v38 = vpop.f32.mrb[4].mxu0 }
 0x102   :  { %v2517_v15 = vpack.c.bf16 %v300_v11, %v295_v13  ;;  %v2647_v16 = vpack.i.bf16 %v300_v11, %v295_v13  ;;  %v2186_v17 = vpop.f32.mrb[2].mxu1  ;;  %v186_v42 = vpop.f32.mrb[5].mxu0  ;;  %v192_v58 = vadd.f32 %v2145_v38, %v3054_v20  ;;  %v344_v11 = vld [vmem:[%s3630_s6 + $0x58] sm:$0xff]  ;;  %v345_v13 = vld [vmem:[%s3630_s6 + $0x60] sm:$0xff] }
 0x103   :  { %v310_v18 = vadd.f32 %v2186_v17, %v1865_v8  ;;  %v304_v9 = vpop.f32.mrb[3].mxu1  ;;  %v187_v45 = vadd.f32 %v3054_v20, %v186_v42  ;;  %v2505_v12 = vpack.c.bf16 %v344_v11, %v343_v10  ;;  %v347_v17 = vld [vmem:[%s3630_s6 + $0x70] sm:$0xff] }
 0x104   :  { %2648 = vrot.lane.b32.xlu0 %v2647_v16, %s2783_s1  ;;  %2519 = vmatprep.subr.msk.bf16.mxu1 %vm3044_vm1, %v2517_v15  ;;  %v305_v19 = vadd.f32 %v1865_v8, %v304_v9 }
 0x105   :  { %2522 = vmatpush3.bf16.xpose.msk.msra.mxu1 %vm3044_vm1, %v2517_v15  ;;  %v2148_v43 = vpop.f32.mrb[6].mxu0  ;;  %v346_v15 = vld [vmem:[%s3630_s6 + $0x68] sm:$0xff] }
 0x106   :  { %v2652_v22 = vpack.i.bf16 %v310_v18, %v305_v19  ;;  %v2523_v23 = vpack.c.bf16 %v310_v18, %v305_v19  ;;  %v2189_v24 = vpop.f32.mrb[4].mxu1  ;;  %v196_v46 = vpop.f32.mrb[7].mxu0  ;;  %v202_v0 = vadd.f32 %v2148_v43, %v3054_v20  ;;  %v2509_v16 = vpack.c.bf16 %v346_v15, %v345_v13  ;;  %v348_v18 = vld [vmem:[%s3630_s6 + $0x78] sm:$0xff] }
 0x107   :  { %v320_v26 = vadd.f32 %v2189_v24, %v1865_v8  ;;  %v314_v27 = vpop.f32.mrb[5].mxu1  ;;  %v197_v57 = vadd.f32 %v3054_v20, %v196_v46  ;;  %v2513_v9 = vpack.c.bf16 %v348_v18, %v347_v17 }
 0x108   :  { %2653 = vrot.lane.b32.xlu0 %v2652_v22, %s2783_s1  ;;  %2525 = vmatprep.subr.msk.bf16.mxu1 %vm3044_vm1, %v2523_v23  ;;  %v315_v29 = vadd.f32 %v1865_v8, %v314_v27 }
 0x10a   :  { %v2529_v31 = vpack.c.bf16 %v320_v26, %v315_v29  ;;  %v2657_v32 = vpack.i.bf16 %v320_v26, %v315_v29  ;;  %v2192_v33 = vpop.f32.mrb[6].mxu1 }
 0x10b   :  { %v330_v35 = vadd.f32 %v2192_v33, %v1865_v8  ;;  %v324_v36 = vpop.f32.mrb[7].mxu1 }
 0x10c   :  { %2658 = vrot.lane.b32.xlu1 %v2657_v32, %s2783_s1  ;;  %v325_v37 = vadd.f32 %v1865_v8, %v324_v36  ;;  %841 = vrot.lane.b32.xlu0 %v167_v28, %s2783_s1  ;;  %v2501_v8 = vpack.c.bf16 %v342_v7, %v341_v6 }
 0x10d   :  { %2528 = vmatpush3.bf16.xpose.msk.msra.mxu1 %vm3044_vm1, %v2523_v23 }
 0x10e   :  { %2531 = vmatprep.subr.msk.bf16.mxu1 %vm3044_vm1, %v2529_v31  ;;  %v2662_v39 = vpack.i.bf16 %v330_v35, %v325_v37  ;;  %v2535_v40 = vpack.c.bf16 %v330_v35, %v325_v37  ;;  %2502 = vmatprep.subr.bf16.mxu0 %v2501_v8 }
 0x10f   :  { %2504 = vmatpush3.bf16.msra.mxu0 %v2501_v8 }
 0x110   :  { %2663 = vrot.lane.b32.xlu1 %v2662_v39, %s2783_s1  ;;  %845 = vrot.lane.b32.xlu0 %v177_v41, %s2783_s1 }
 0x111   :  { %2506 = vmatprep.subr.bf16.mxu0 %v2505_v12 }
 0x113   :  { %2508 = vmatpush3.bf16.msra.mxu0 %v2505_v12 }
 0x114   :  { %843 = vrot.lane.b32.xlu1 %v172_v44, %s2783_s1  ;;  %849 = vrot.lane.b32.xlu0 %v187_v45, %s2783_s1 }
 0x115   :  { %2534 = vmatpush3.bf16.xpose.msk.msra.mxu1 %vm3044_vm1, %v2529_v31  ;;  %2510 = vmatprep.subr.bf16.mxu0 %v2509_v16 }
 0x116   :  { %2537 = vmatprep.subr.msk.bf16.mxu1 %vm3044_vm1, %v2535_v40 }
 0x117   :  { %2512 = vmatpush3.bf16.msra.mxu0 %v2509_v16 }
 0x118   :  { %847 = vrot.lane.b32.xlu1 %v182_v55, %s2783_s1  ;;  %853 = vrot.lane.b32.xlu0 %v197_v57, %s2783_s1 }
 0x119   :  { %2514 = vmatprep.subr.bf16.mxu0 %v2513_v9 }
 0x11b   :  { %2516 = vmatpush3.bf16.msra.mxu0 %v2513_v9 }
 0x11c   :  { %851 = vrot.lane.b32.xlu1 %v192_v58, %s2783_s1 }
 0x11d   :  { %2540 = vmatpush3.bf16.xpose.msk.msra.mxu1 %vm3044_vm1, %v2535_v40 }
 0x11e   :  { %2226 = vmatmul.mubr.f32.vlgmr.msra.gmra.mrb[8].mxu0 %v2972_v47 }
 0x11f   :  { %2228 = vmatprep.mubr.f32.mxu0 %v2980_v49 }
 0x120   :  { %855 = vrot.lane.b32.xlu1 %v202_v0, %s2783_s1 }
 0x122   :  { %2229 = vmatmul.mubr.f32.gmra.mrb[10].mxu0 %v2996_v56 }
 0x123   :  { %2231 = vmatprep.mubr.f32.mxu0 %v3004_v59 }
 0x124   :  { %2254 = vmatmul.mubr.msk.f32.vlgmr.msra.gmra.mrb[8].mxu1 %vm461_vm0, %v172_v44 }
 0x125   :  { %2256 = vmatprep.mubr.msk.f32.mxu1 %vm461_vm0, %v177_v41 }
 0x126   :  { %2232 = vmatmul.mubr.f32.gmra.mrb[12].mxu0 %v3014_v63 }
 0x127   :  { %2234 = vmatprep.mubr.f32.mxu0 %v3022_v1 }
 0x128   :  { %2257 = vmatmul.mubr.msk.f32.gmra.mrb[10].mxu1 %vm461_vm0, %v182_v55 }
 0x129   :  { %2259 = vmatprep.mubr.msk.f32.mxu1 %vm461_vm0, %v187_v45 }
 0x12a   :  { %2235 = vmatmul.mubr.f32.gmra.mrb[14].mxu0 %v3032_v5 }
 0x12c   :  { %2260 = vmatmul.mubr.msk.f32.gmra.mrb[12].mxu1 %vm461_vm0, %v192_v58 }
 0x12d   :  { %2262 = vmatprep.mubr.msk.f32.mxu1 %vm461_vm0, %v197_v57 }
 0x130   :  { %2263 = vmatmul.mubr.msk.f32.gmra.mrb[14].mxu1 %vm461_vm0, %v202_v0 }
 0x176   :  { %v2649_v19 = vpop.permute.xlu0 %2648 }
 0x177   :  { %v2651_v20 = vunpack.i.h.bf16 %v2649_v19  ;;  %v2650_v21 = vunpack.i.l.bf16 %v2649_v19 }
 0x179   :  { %v2557_v22 = vpack.c.bf16 %v2651_v20, %v2650_v21 }
 0x17a   :  { %v2654_v23 = vpop.permute.xlu0 %2653 }
 0x17b   :  { %2559 = vmatprep.subr.msk.bf16.mxu1 %vm3044_vm1, %v2557_v22  ;;  %v2656_v47 = vunpack.i.h.bf16 %v2654_v23  ;;  %v2655_v49 = vunpack.i.l.bf16 %v2654_v23 }
 0x17c   :  { %2562 = vmatpush3.bf16.xpose.msk.msra.mxu1 %vm3044_vm1, %v2557_v22 }
 0x17d   :  { %v2563_v56 = vpack.c.bf16 %v2656_v47, %v2655_v49 }
 0x17e   :  { %v2659_v59 = vpop.permute.xlu1 %2658  ;;  %v842_v63 = vpop.permute.xlu0 %841 }
 0x17f   :  { %2565 = vmatprep.subr.msk.bf16.mxu1 %vm3044_vm1, %v2563_v56  ;;  %v2661_v1 = vunpack.i.h.bf16 %v2659_v59  ;;  %v2660_v5 = vunpack.i.l.bf16 %v2659_v59  ;;  %2309 = vmatprep.mubr.msk.f32.mxu1 %vm461_vm0, %v842_v63 }
 0x181   :  { %v2569_v24 = vpack.c.bf16 %v2661_v1, %v2660_v5 }
 0x182   :  { %v2664_v25 = vpop.permute.xlu1 %2663  ;;  %v846_v30 = vpop.permute.xlu0 %845 }
 0x183   :  { %v2666_v26 = vunpack.i.h.bf16 %v2664_v25  ;;  %v2665_v27 = vunpack.i.l.bf16 %v2664_v25 }
 0x184   :  { %2568 = vmatpush3.bf16.xpose.msk.msra.mxu1 %vm3044_vm1, %v2563_v56 }
 0x185   :  { %2571 = vmatprep.subr.msk.bf16.mxu1 %vm3044_vm1, %v2569_v24  ;;  %v2575_v28 = vpack.c.bf16 %v2666_v26, %v2665_v27 }
 0x186   :  { %v844_v29 = vpop.permute.xlu1 %843  ;;  %v850_v32 = vpop.permute.xlu0 %849 }
 0x18a   :  { %v848_v31 = vpop.permute.xlu1 %847  ;;  %v854_v34 = vpop.permute.xlu0 %853 }
 0x18c   :  { %2574 = vmatpush3.bf16.xpose.msk.msra.mxu1 %vm3044_vm1, %v2569_v24 }
 0x18d   :  { %2577 = vmatprep.subr.msk.bf16.mxu1 %vm3044_vm1, %v2575_v28 }
 0x18e   :  { %v852_v33 = vpop.permute.xlu1 %851 }
 0x192   :  { %v856_v14 = vpop.permute.xlu1 %855 }
 0x194   :  { %2580 = vmatpush3.bf16.xpose.msk.msra.mxu1 %vm3044_vm1, %v2575_v28 }
 0x19b   :  { %2310 = vmatmul.mubr.msk.f32.vlgmr.msra.gmra.mrb[16].mxu1 %vm461_vm0, %v844_v29 }
 0x19c   :  { %2312 = vmatprep.mubr.msk.f32.mxu1 %vm461_vm0, %v846_v30 }
 0x19f   :  { %2313 = vmatmul.mubr.msk.f32.gmra.mrb[18].mxu1 %vm461_vm0, %v848_v31 }
 0x1a0   :  { %2315 = vmatprep.mubr.msk.f32.mxu1 %vm461_vm0, %v850_v32 }
 0x1a3   :  { %2316 = vmatmul.mubr.msk.f32.gmra.mrb[20].mxu1 %vm461_vm0, %v852_v33 }
 0x1a4   :  { %2318 = vmatprep.mubr.msk.f32.mxu1 %vm461_vm0, %v854_v34 }
 0x1a7   :  { %2319 = vmatmul.mubr.msk.f32.gmra.mrb[22].mxu1 %vm461_vm0, %v856_v14 }
 0x1f1   :  { %v2227_v52 = vpop.f32.mrb[8].mxu0 }
 0x1f2   :  { %v422_v55 = vpop.f32.mrb[9].mxu0  ;;  %v428_v57 = vadd.f32 %v2227_v52, %v3199_v54 }
 0x1f3   :  { %v423_v58 = vadd.f32 %v3199_v54, %v422_v55 }
 0x1f5   :  { %v2667_v60 = vpack.i.bf16 %v428_v57, %v423_v58  ;;  %v2541_v61 = vpack.c.bf16 %v428_v57, %v423_v58 }
 0x1f7   :  { %v2255_v35 = vpop.f32.mrb[8].mxu1  ;;  %2542 = vmatprep.subr.bf16.mxu0 %v2541_v61 }
 0x1f8   :  { %v3176_v36 = vpop.f32.mrb[9].mxu1  ;;  %v619_v37 = vsel %vm615_vm2, %v2255_v35, -inf  ;;  %2544 = vmatpush3.bf16.msra.mxu0 %v2541_v61 }
 0x1f9   :  { %620 = vmax.xlane.f32.xlu1 %v619_v37  ;;  %v616_v38 = vsel %vm615_vm2, %v3176_v36, -inf }
 0x1fa   :  { %617 = vmax.xlane.f32.xlu0 %v616_v38 }
 0x1fb   :  { %v2258_v39 = vpop.f32.mrb[10].mxu1 }
 0x1fc   :  { %v3181_v40 = vpop.f32.mrb[11].mxu1  ;;  %v625_v44 = vsel %vm615_vm2, %v2258_v39, -inf }
 0x1fd   :  { %v622_v41 = vsel %vm615_vm2, %v3181_v40, -inf }
 0x1fe   :  { %623 = vmax.xlane.f32.xlu0 %v622_v41 }
 0x1ff   :  { %v2261_v42 = vpop.f32.mrb[12].mxu1 }
 0x200   :  { %v3185_v43 = vpop.f32.mrb[13].mxu1  ;;  %v631_v50 = vsel %vm615_vm2, %v2261_v42, -inf }
 0x201   :  { %v628_v45 = vsel %vm615_vm2, %v3185_v43, -inf }
 0x202   :  { %626 = vmax.xlane.f32.xlu0 %v625_v44  ;;  %629 = vmax.xlane.f32.xlu1 %v628_v45  ;;  %v2230_v45 = vpop.f32.mrb[10].mxu0 }
 0x203   :  { %v2264_v46 = vpop.f32.mrb[14].mxu1 }
 0x204   :  { %v3190_v48 = vpop.f32.mrb[15].mxu1  ;;  %v637_v53 = vsel %vm615_vm2, %v2264_v46, -inf }
 0x205   :  { %v634_v51 = vsel %vm615_vm2, %v3190_v48, -inf }
 0x206   :  { %632 = vmax.xlane.f32.xlu0 %v631_v50  ;;  %635 = vmax.xlane.f32.xlu1 %v634_v51  ;;  %v3265_v50 = vadd.f32 %v2230_v45, %v3199_v54  ;;  %v432_v51 = vpop.f32.mrb[11].mxu0 }
 0x207   :  { %v3270_v52 = vadd.f32 %v3199_v54, %v432_v51 }
 0x209   :  { %v2545_v61 = vpack.c.bf16 %v3265_v50, %v3270_v52 }
 0x20a   :  { %638 = vmax.xlane.f32.xlu0 %v637_v53  ;;  %v2233_v53 = vpop.f32.mrb[12].mxu0 }
 0x20b   :  { %v3273_v55 = vadd.f32 %v2233_v53, %v3199_v54  ;;  %v442_v57 = vpop.f32.mrb[13].mxu0  ;;  %2546 = vmatprep.subr.bf16.mxu0 %v2545_v61 }
 0x20c   :  { %2548 = vmatpush3.bf16.msra.mxu0 %v2545_v61 }
 0x26e   :  { %v3203_v62 = vpop.f32.mrb[16].mxu1 }
 0x26f   :  { %v3205_v0 = vpop.f32.mrb[17].mxu1  ;;  %v1013_v2 = vsel %vm615_vm2, %v3203_v62, -inf }
 0x270   :  { %1014 = vmax.xlane.f32.xlu0 %v1013_v2  ;;  %v1010_v3 = vsel %vm615_vm2, %v3205_v0, -inf  ;;  %v3282_v2 = vadd.f32 %v3199_v54, %v442_v57 }
 0x271   :  { %1011 = vmax.xlane.f32.xlu1 %v1010_v3  ;;  %v2236_v3 = vpop.f32.mrb[14].mxu0 }
 0x272   :  { %v3211_v4 = vpop.f32.mrb[18].mxu1 }
 0x273   :  { %v3213_v6 = vpop.f32.mrb[19].mxu1  ;;  %v1019_v7 = vsel %vm615_vm2, %v3211_v4, -inf }
 0x274   :  { %1020 = vmax.xlane.f32.xlu0 %v1019_v7  ;;  %v1016_v8 = vsel %vm615_vm2, %v3213_v6, -inf }
 0x275   :  { %1017 = vmax.xlane.f32.xlu1 %v1016_v8  ;;  %v3287_v8 = vadd.f32 %v2236_v3, %v3199_v54 }
 0x276   :  { %v3219_v10 = vpop.f32.mrb[20].mxu1 }
 0x277   :  { %v3221_v11 = vpop.f32.mrb[21].mxu1  ;;  %v1025_v12 = vsel %vm615_vm2, %v3219_v10, -inf }
 0x278   :  { %1026 = vmax.xlane.f32.xlu0 %v1025_v12  ;;  %v1022_v13 = vsel %vm615_vm2, %v3221_v11, -inf  ;;  %v452_v12 = vpop.f32.mrb[15].mxu0 }
 0x279   :  { %1023 = vmax.xlane.f32.xlu1 %v1022_v13  ;;  %v2677_v13 = vpack.i.bf16 %v3273_v55, %v3282_v2 }
 0x27a   :  { %v3227_v15 = vpop.f32.mrb[22].mxu1 }
 0x27b   :  { %v3229_v16 = vpop.f32.mrb[23].mxu1  ;;  %v1031_v17 = vsel %vm615_vm2, %v3227_v15, -inf }
 0x27c   :  { %1032 = vmax.xlane.f32.xlu0 %v1031_v17  ;;  %v1028_v18 = vsel %vm615_vm2, %v3229_v16, -inf  ;;  %v2549_v17 = vpack.c.bf16 %v3273_v55, %v3282_v2 }
 0x27d   :  { %1029 = vmax.xlane.f32.xlu1 %v1028_v18  ;;  %v3294_v18 = vadd.f32 %v3199_v54, %v452_v12 }
 0x27e   :  { %2550 = vmatprep.subr.bf16.mxu0 %v2549_v17 }
 0x27f   :  { %2552 = vmatpush3.bf16.msra.mxu0 %v2549_v17 }
 0x286   :  { %v621_v9 = vpop.xlane.xlu1 %620 }
 0x287   :  { %v641_v19 = vsub.f32 %v2255_v35, %v621_v9  ;;  %v618_v20 = vpop.xlane.xlu0 %617 }
 0x288   :  { %v640_v27 = vsub.f32 %v3176_v36, %v618_v20  ;;  %v2553_v20 = vpack.c.bf16 %v3287_v8, %v3294_v18 }
 0x289   :  { %v650_v21 = vmul.f32 1.442695, %v641_v19  ;;  %v2682_v19 = vpack.i.bf16 %v3287_v8, %v3294_v18 }
 0x28a   :  { %v648_v31 = vmul.f32 1.442695, %v640_v27  ;;  %2554 = vmatprep.subr.bf16.mxu0 %v2553_v20 }
 0x28b   :  { %2687 = vpow2.f32 %v650_v21  ;;  %v624_v22 = vpop.xlane.xlu0 %623  ;;  %2556 = vmatpush3.bf16.msra.mxu0 %v2553_v20 }
 0x28c   :  { %v642_v32 = vsub.f32 %v3181_v40, %v624_v22 }
 0x28e   :  { %2668 = vrot.lane.b32.xlu1 %v2667_v60, %s2783_s1  ;;  %v652_v14 = vmul.f32 1.442695, %v642_v32  ;;  %v2672_v60 = vpack.i.bf16 %v3265_v50, %v3270_v52 }
 0x28f   :  { %v627_v23 = vpop.xlane.xlu0 %626  ;;  %v630_v29 = vpop.xlane.xlu1 %629 }
 0x290   :  { %v643_v47 = vsub.f32 %v2258_v39, %v627_v23  ;;  %v644_v35 = vsub.f32 %v3185_v43, %v630_v29 }
 0x292   :  { %v654_v49 = vmul.f32 1.442695, %v643_v47  ;;  %v656_v39 = vmul.f32 1.442695, %v644_v35 }
 0x293   :  { %v633_v56 = vpop.xlane.xlu0 %632  ;;  %v636_v36 = vpop.xlane.xlu1 %635 }
 0x294   :  { %2689 = vpow2.f32 %v654_v49  ;;  %v645_v59 = vsub.f32 %v2261_v42, %v633_v56  ;;  %v646_v40 = vsub.f32 %v3190_v48, %v636_v36 }
 0x295   :  { %v3236_v63 = vpop.eup %2687 }
 0x296   :  { %v658_v1 = vmul.f32 1.442695, %v645_v59  ;;  %v667_v5 = vsel %vm615_vm2, %v3236_v63, 0.0  ;;  %v660_v41 = vmul.f32 1.442695, %v646_v40 }
 0x297   :  { %v639_v24 = vpop.xlane.xlu0 %638  ;;  %668 = vadd.xlane.f32.xlu0 %v667_v5 }
 0x298   :  { %2691 = vpow2.f32 %v658_v1  ;;  %v647_v25 = vsub.f32 %v2264_v46, %v639_v24 }
 0x29a   :  { %v662_v26 = vmul.f32 1.442695, %v647_v25 }
 0x29c   :  { %2693 = vpow2.f32 %v662_v26 }
 0x29d   :  { %2695 = vpow2.f32 %v648_v31 }
 0x29e   :  { %v3241_v28 = vpop.eup %2689  ;;  %2697 = vpow2.f32 %v652_v14 }
 0x29f   :  { %v673_v30 = vsel %vm615_vm2, %v3241_v28, 0.0  ;;  %2699 = vpow2.f32 %v656_v39 }
 0x2a0   :  { %674 = vadd.xlane.f32.xlu0 %v673_v30  ;;  %2701 = vpow2.f32 %v660_v41 }
 0x2a2   :  { %v3246_v33 = vpop.eup %2691 }
 0x2a3   :  { %v679_v34 = vsel %vm615_vm2, %v3246_v33, 0.0 }
 0x2a4   :  { %680 = vadd.xlane.f32.xlu0 %v679_v34 }
 0x2a6   :  { %v3251_v37 = vpop.eup %2693 }
 0x2a7   :  { %v685_v38 = vsel %vm615_vm2, %v3251_v37, 0.0  ;;  %v3256_v42 = vpop.eup %2695 }
 0x2a8   :  { %686 = vadd.xlane.f32.xlu0 %v685_v38  ;;  %v664_v43 = vsel %vm615_vm2, %v3256_v42, 0.0  ;;  %v3260_v44 = vpop.eup %2697 }
 0x2a9   :  { %v670_v46 = vsel %vm615_vm2, %v3260_v44, 0.0  ;;  %v3267_v48 = vpop.eup %2699 }
 0x2aa   :  { %v676_v58 = vsel %vm615_vm2, %v3267_v48, 0.0  ;;  %v3284_v7 = vpop.eup %2701 }
 0x2ab   :  { %v682_v9 = vsel %vm615_vm2, %v3284_v7, 0.0 }
 0x2b2   :  { %665 = vadd.xlane.f32.xlu1 %v664_v43 }
 0x2b6   :  { %671 = vadd.xlane.f32.xlu1 %v670_v46 }
 0x2ba   :  { %677 = vadd.xlane.f32.xlu1 %v676_v58 }
 0x2be   :  { %683 = vadd.xlane.f32.xlu1 %v682_v9 }
 0x2fd   :  { %v1015_v21 = vpop.xlane.xlu0 %1014 }
 0x2fe   :  { %v1035_v22 = vsub.f32 %v3203_v62, %v1015_v21  ;;  %v1012_v54 = vpop.xlane.xlu1 %1011 }
 0x2ff   :  { %v1034_v23 = vsub.f32 %v3205_v0, %v1012_v54 }
 0x300   :  { %v1044_v47 = vmul.f32 1.442695, %v1035_v22 }
 0x301   :  { %v1042_v49 = vmul.f32 1.442695, %v1034_v23  ;;  %v1021_v56 = vpop.xlane.xlu0 %1020 }
 0x302   :  { %2703 = vpow2.f32 %v1044_v47  ;;  %v1037_v59 = vsub.f32 %v3211_v4, %v1021_v56  ;;  %v1018_v1 = vpop.xlane.xlu1 %1017 }
 0x303   :  { %2705 = vpow2.f32 %v1042_v49  ;;  %v1036_v5 = vsub.f32 %v3213_v6, %v1018_v1 }
 0x304   :  { %v1048_v24 = vmul.f32 1.442695, %v1037_v59 }
 0x305   :  { %v1046_v25 = vmul.f32 1.442695, %v1036_v5  ;;  %v1027_v26 = vpop.xlane.xlu0 %1026 }
 0x306   :  { %2707 = vpow2.f32 %v1048_v24  ;;  %v1039_v27 = vsub.f32 %v3219_v10, %v1027_v26  ;;  %v1024_v62 = vpop.xlane.xlu1 %1023 }
 0x307   :  { %2709 = vpow2.f32 %v1046_v25  ;;  %v1038_v0 = vsub.f32 %v3221_v11, %v1024_v62 }
 0x308   :  { %v1052_v29 = vmul.f32 1.442695, %v1039_v27 }
 0x309   :  { %v1050_v30 = vmul.f32 1.442695, %v1038_v0  ;;  %v1033_v31 = vpop.xlane.xlu0 %1032 }
 0x30a   :  { %2711 = vpow2.f32 %v1052_v29  ;;  %v1041_v4 = vsub.f32 %v3227_v15, %v1033_v31  ;;  %v1030_v32 = vpop.xlane.xlu1 %1029 }
 0x30b   :  { %2713 = vpow2.f32 %v1050_v30  ;;  %v1040_v6 = vsub.f32 %v3229_v16, %v1030_v32 }
 0x30c   :  { %v3310_v34 = vpop.eup %2703  ;;  %v1056_v14 = vmul.f32 1.442695, %v1041_v4 }
 0x30d   :  { %v3312_v35 = vpop.eup %2705  ;;  %v1054_v10 = vmul.f32 1.442695, %v1040_v6  ;;  %v1061_v36 = vsel %vm615_vm2, %v3310_v34, 0.0 }
 0x30e   :  { %2715 = vpow2.f32 %v1056_v14  ;;  %1062 = vadd.xlane.f32.xlu0 %v1061_v36  ;;  %v1058_v11 = vsel %vm615_vm2, %v3312_v35, 0.0  ;;  %v2669_v38 = vpop.permute.xlu1 %2668 }
 0x30f   :  { %1059 = vadd.xlane.f32.xlu1 %v1058_v11  ;;  %v2671_v15 = vunpack.i.h.bf16 %v2669_v38  ;;  %v2670_v39 = vunpack.i.l.bf16 %v2669_v38  ;;  %2717 = vpow2.f32 %v1054_v10 }
 0x310   :  { %v3318_v40 = vpop.eup %2707 }
 0x311   :  { %v3320_v16 = vpop.eup %2709  ;;  %v1067_v41 = vsel %vm615_vm2, %v3318_v40, 0.0  ;;  %v2581_v43 = vpack.c.bf16 %v2671_v15, %v2670_v39 }
 0x312   :  { %1068 = vadd.xlane.f32.xlu0 %v1067_v41  ;;  %v1064_v45 = vsel %vm615_vm2, %v3320_v16, 0.0 }
 0x313   :  { %1065 = vadd.xlane.f32.xlu1 %v1064_v45  ;;  %2582 = vmatprep.subr.bf16.mxu0 %v2581_v43 }
 0x314   :  { %v3326_v46 = vpop.eup %2711 }
 0x315   :  { %v3328_v51 = vpop.eup %2713  ;;  %v1073_v53 = vsel %vm615_vm2, %v3326_v46, 0.0 }
 0x316   :  { %1074 = vadd.xlane.f32.xlu0 %v1073_v53  ;;  %v1070_v57 = vsel %vm615_vm2, %v3328_v51, 0.0 }
 0x317   :  { %1071 = vadd.xlane.f32.xlu1 %v1070_v57 }
 0x318   :  { %v3334_v58 = vpop.eup %2715 }
 0x319   :  { %v1079_v61 = vsel %vm615_vm2, %v3334_v58, 0.0  ;;  %v3338_v3 = vpop.eup %2717 }
 0x31a   :  { %1080 = vadd.xlane.f32.xlu0 %v1079_v61  ;;  %v1076_v12 = vsel %vm615_vm2, %v3338_v3, 0.0 }
 0x31e   :  { %1077 = vadd.xlane.f32.xlu0 %v1076_v12 }
 0x324   :  { %v669_v17 = vpop.xlane.xlu0 %668 }
 0x325   :  { %2719 = vrcp.f32 %v669_v17 }
 0x328   :  { %2678 = vrot.lane.b32.xlu1 %v2677_v13, %s2783_s1 }
 0x32c   :  { %2683 = vrot.lane.b32.xlu1 %v2682_v19, %s2783_s1 }
 0x32d   :  { %v675_v9 = vpop.xlane.xlu0 %674 }
 0x32f   :  { %v2720_v8 = vpop.eup %2719 }
 0x330   :  { %v697_v52 = vmul.f32 %v2720_v8, %v3236_v63  ;;  %v1310_v8 = vld [vmem:[%s3632_s8 + $0x10] sm:$0xff] }
 0x331   :  { %v681_v21 = vpop.xlane.xlu0 %680 }
 0x334   :  { %2673 = vrot.lane.b32.xlu0 %v2672_v60, %s2783_s1 }
 0x335   :  { %v687_v2 = vpop.xlane.xlu0 %686 }
 0x33f   :  { %v666_v20 = vpop.xlane.xlu1 %665 }
 0x340   :  { %2721 = vrcp.f32 %v666_v20 }
 0x341   :  { %2723 = vrcp.f32 %v675_v9 }
 0x343   :  { %v672_v22 = vpop.xlane.xlu1 %671 }
 0x344   :  { %2725 = vrcp.f32 %v672_v22 }
 0x345   :  { %2727 = vrcp.f32 %v681_v21 }
 0x347   :  { %v678_v55 = vpop.xlane.xlu1 %677 }
 0x348   :  { %2729 = vrcp.f32 %v678_v55 }
 0x349   :  { %2731 = vrcp.f32 %v687_v2 }
 0x34a   :  { %v2722_v13 = vpop.eup %2721 }
 0x34b   :  { %v684_v18 = vpop.xlane.xlu1 %683  ;;  %v696_v50 = vmul.f32 %v2722_v13, %v3256_v42  ;;  %v2724_v60 = vpop.eup %2723  ;;  %v1311_v13 = vld [vmem:[%s3632_s8 + $0x18] sm:$0xff] }
 0x34c   :  { %2733 = vrcp.f32 %v684_v18  ;;  %v699_v23 = vmul.f32 %v2724_v60, %v3241_v28  ;;  %v2601_v18 = vpack.c.bf16 %v1311_v13, %v1310_v8 }
 0x34d   :  { %2281 = vmatprep.mubr.msk.f32.mxu0 %vm615_vm2, %v696_v50  ;;  %v1312_v50 = vld [vmem:[%s3632_s8 + $0x20] sm:$0xff] }
 0x34e   :  { %v2726_v19 = vpop.eup %2725  ;;  %2282 = vmatmul.mubr.msk.f32.vlgmr.msra.gmra.mrb[16].mxu0 %vm615_vm2, %v697_v52  ;;  %v1313_v52 = vld [vmem:[%s3632_s8 + $0x28] sm:$0xff] }
 0x34f   :  { %v698_v54 = vmul.f32 %v2726_v19, %v3260_v44  ;;  %2584 = vmatpush3.bf16.msra.mxu0 %v2581_v43  ;;  %v2728_v47 = vpop.eup %2727  ;;  %v2605_v60 = vpack.c.bf16 %v1313_v52, %v1312_v50  ;;  %v1314_v19 = vld [vmem:[%s3632_s8 + $0x30] sm:$0xff] }
 0x350   :  { %v701_v42 = vmul.f32 %v2728_v47, %v3246_v33 }
 0x351   :  { %2284 = vmatprep.mubr.msk.f32.mxu0 %vm615_vm2, %v698_v54  ;;  %v1315_v54 = vld [vmem:[%s3632_s8 + $0x38] sm:$0xff] }
 0x352   :  { %v2730_v49 = vpop.eup %2729  ;;  %2285 = vmatmul.mubr.msk.f32.gmra.mrb[18].mxu0 %vm615_vm2, %v699_v23  ;;  %v2609_v23 = vpack.c.bf16 %v1315_v54, %v1314_v19 }
 0x353   :  { %v700_v63 = vmul.f32 %v2730_v49, %v3267_v48  ;;  %v2732_v56 = vpop.eup %2731 }
 0x354   :  { %v703_v28 = vmul.f32 %v2732_v56, %v3251_v37 }
 0x355   :  { %2287 = vmatprep.mubr.msk.f32.mxu0 %vm615_vm2, %v700_v63 }
 0x356   :  { %v2734_v59 = vpop.eup %2733  ;;  %2288 = vmatmul.mubr.msk.f32.gmra.mrb[20].mxu0 %vm615_vm2, %v701_v42 }
 0x357   :  { %v702_v44 = vmul.f32 %v2734_v59, %v3284_v7 }
 0x359   :  { %2290 = vmatprep.mubr.msk.f32.mxu0 %vm615_vm2, %v702_v44 }
 0x35a   :  { %2291 = vmatmul.mubr.msk.f32.gmra.mrb[22].mxu0 %vm615_vm2, %v703_v28 }
 0x39b   :  { %v1063_v1 = vpop.xlane.xlu0 %1062 }
 0x39c   :  { %v1060_v5 = vpop.xlane.xlu1 %1059 }
 0x39d   :  { %2735 = vrcp.f32 %v1060_v5 }
 0x39e   :  { %2737 = vrcp.f32 %v1063_v1 }
 0x39f   :  { %v1069_v48 = vpop.xlane.xlu0 %1068 }
 0x3a0   :  { %v1066_v24 = vpop.xlane.xlu1 %1065 }
 0x3a1   :  { %2739 = vrcp.f32 %v1066_v24 }
 0x3a2   :  { %2741 = vrcp.f32 %v1069_v48 }
 0x3a3   :  { %v1075_v33 = vpop.xlane.xlu0 %1074 }
 0x3a4   :  { %v1072_v25 = vpop.xlane.xlu1 %1071 }
 0x3a5   :  { %2743 = vrcp.f32 %v1072_v25 }
 0x3a6   :  { %2745 = vrcp.f32 %v1075_v33 }
 0x3a7   :  { %v2736_v26 = vpop.eup %2735  ;;  %v1081_v27 = vpop.xlane.xlu0 %1080 }
 0x3a8   :  { %v1090_v62 = vmul.f32 %v2736_v26, %v3312_v35  ;;  %v2679_v0 = vpop.permute.xlu1 %2678  ;;  %v2738_v11 = vpop.eup %2737 }
 0x3a9   :  { %v2681_v37 = vunpack.i.h.bf16 %v2679_v0  ;;  %v2680_v29 = vunpack.i.l.bf16 %v2679_v0  ;;  %v1091_v15 = vmul.f32 %v2738_v11, %v3310_v34 }
 0x3aa   :  { %2337 = vmatprep.mubr.msk.f32.mxu0 %vm615_vm2, %v1090_v62 }
 0x3ab   :  { %v1078_v7 = vpop.xlane.xlu0 %1077  ;;  %v2589_v14 = vpack.c.bf16 %v2681_v37, %v2680_v29  ;;  %v2740_v38 = vpop.eup %2739 }
 0x3ac   :  { %v2684_v31 = vpop.permute.xlu1 %2683  ;;  %2747 = vrcp.f32 %v1078_v7  ;;  %v2742_v39 = vpop.eup %2741  ;;  %v1092_v41 = vmul.f32 %v2740_v38, %v3320_v16 }
 0x3ad   :  { %v2686_v10 = vunpack.i.h.bf16 %v2684_v31  ;;  %v2685_v36 = vunpack.i.l.bf16 %v2684_v31  ;;  %2749 = vrcp.f32 %v1081_v27  ;;  %v1093_v45 = vmul.f32 %v2742_v39, %v3318_v40 }
 0x3af   :  { %v2674_v30 = vpop.permute.xlu0 %2673  ;;  %v2593_v35 = vpack.c.bf16 %v2686_v10, %v2685_v36  ;;  %v2744_v43 = vpop.eup %2743 }
 0x3b0   :  { %v2676_v4 = vunpack.i.h.bf16 %v2674_v30  ;;  %v2675_v32 = vunpack.i.l.bf16 %v2674_v30  ;;  %v2746_v53 = vpop.eup %2745  ;;  %v1094_v57 = vmul.f32 %v2744_v43, %v3328_v51 }
 0x3b1   :  { %v1095_v34 = vmul.f32 %v2746_v53, %v3326_v46 }
 0x3b2   :  { %v2585_v6 = vpack.c.bf16 %v2676_v4, %v2675_v32  ;;  %v1915_v32 = vld [vmem:[%s3633_s9] ss:$0 sm:$0xff] }
 0x3b4   :  { %2586 = vmatprep.subr.bf16.mxu0 %v2585_v6 }
 0x3b5   :  { %2588 = vmatpush3.bf16.msra.mxu0 %v2585_v6 }
 0x3b6   :  { %2590 = vmatprep.subr.bf16.mxu0 %v2589_v14  ;;  %v2748_v61 = vpop.eup %2747 }
 0x3b7   :  { %v2750_v12 = vpop.eup %2749  ;;  %v1096_v16 = vmul.f32 %v2748_v61, %v3338_v3  ;;  %v1308_v3 = vld [vmem:[%s3632_s8] sm:$0xff] }
 0x3b8   :  { %v1097_v17 = vmul.f32 %v2750_v12, %v3334_v58  ;;  %v1309_v58 = vld [vmem:[%s3632_s8 + $0x8] sm:$0xff]  ;;  %v1589_v12 = vld [vmem:[%s3634_s12] sm:$0xff] }
 0x3b9   :  { %2592 = vmatpush3.bf16.msra.mxu0 %v2589_v14  ;;  %v2597_v20 = vpack.c.bf16 %v1309_v58, %v1308_v3 }
 0x3ba   :  { %2594 = vmatprep.subr.bf16.mxu0 %v2593_v35 }
 0x3bd   :  { %2596 = vmatpush3.bf16.msra.mxu0 %v2593_v35 }
 0x3be   :  { %2598 = vmatprep.subr.bf16.mxu0 %v2597_v20 }
 0x3c0   :  { %2338 = vmatmul.mubr.msk.f32.vlgmr.msra.gmra.mrb[24].mxu0 %vm615_vm2, %v1091_v15 }
 0x3c1   :  { %2340 = vmatprep.mubr.msk.f32.mxu0 %vm615_vm2, %v1092_v41  ;;  %2600 = vmatpush3.bf16.msra.mxu0 %v2597_v20 }
 0x3c2   :  { %2602 = vmatprep.subr.bf16.mxu0 %v2601_v18 }
 0x3c4   :  { %2341 = vmatmul.mubr.msk.f32.gmra.mrb[26].mxu0 %vm615_vm2, %v1093_v45 }
 0x3c5   :  { %2343 = vmatprep.mubr.msk.f32.mxu0 %vm615_vm2, %v1094_v57  ;;  %2604 = vmatpush3.bf16.msra.mxu0 %v2601_v18 }
 0x3c6   :  { %2606 = vmatprep.subr.bf16.mxu0 %v2605_v60 }
 0x3c8   :  { %2344 = vmatmul.mubr.msk.f32.gmra.mrb[28].mxu0 %vm615_vm2, %v1095_v34 }
 0x3c9   :  { %2346 = vmatprep.mubr.msk.f32.mxu0 %vm615_vm2, %v1096_v16  ;;  %2608 = vmatpush3.bf16.msra.mxu0 %v2605_v60  ;;  %v1590_v16 = vld [vmem:[%s3634_s12 + $0x8] sm:$0xff] }
 0x3ca   :  { %2610 = vmatprep.subr.bf16.mxu0 %v2609_v23 }
 0x3cc   :  { %2347 = vmatmul.mubr.msk.f32.gmra.mrb[30].mxu0 %vm615_vm2, %v1097_v17  ;;  %v1591_v17 = vld [vmem:[%s3634_s12 + $0x10] sm:$0xff] }
 0x3cd   :  { %2612 = vmatpush3.bf16.msra.mxu0 %v2609_v23 }
 0x421   :  { %v2283_v40 = vpop.f32.mrb[16].mxu0 }
 0x422   :  { %834 = vst.msk [vmem:[#allocation2 + $0x8] sm:$0xff] %vm461_vm0, %v2283_v40  ;;  %v794_v51 = vpop.f32.mrb[17].mxu0  ;;  %v2613_v40 = vpack.c.bf16 %v1590_v16, %v1589_v12  ;;  %v1604_v12 = vld [vmem:[%s3634_s12 + $0x78] sm:$0xff] }
 0x423   :  { %833 = vst.msk [vmem:[#allocation2] sm:$0xff] %vm461_vm0, %v794_v51  ;;  %v1592_v51 = vld [vmem:[%s3634_s12 + $0x18] sm:$0xff] }
 0x424   :  { %2614 = vmatprep.subr.bf16.mxu1 %v2613_v40 }
 0x425   :  { %v2286_v9 = vpop.f32.mrb[18].mxu0  ;;  %2616 = vmatpush3.bf16.msra.mxu1 %v2613_v40 }
 0x426   :  { %836 = vst.msk [vmem:[#allocation2 + $0x18] sm:$0xff] %vm461_vm0, %v2286_v9  ;;  %v804_v46 = vpop.f32.mrb[19].mxu0  ;;  %v2617_v9 = vpack.c.bf16 %v1592_v51, %v1591_v17 }
 0x427   :  { %835 = vst.msk [vmem:[#allocation2 + $0x10] sm:$0xff] %vm461_vm0, %v804_v46  ;;  %v1454_v46 = vlaneseq }
 0x428   :  { %2618 = vmatprep.subr.bf16.mxu1 %v2617_v9 }
 0x429   :  { %v2289_v21 = vpop.f32.mrb[20].mxu0  ;;  %2620 = vmatpush3.bf16.msra.mxu1 %v2617_v9  ;;  %v3449_v3 = vand.u32 127, %v1454_v46 }
 0x42a   :  { %838 = vst.msk [vmem:[#allocation2 + $0x28] sm:$0xff] %vm461_vm0, %v2289_v21  ;;  %v814_v22 = vpop.f32.mrb[21].mxu0 }
 0x42b   :  { %837 = vst.msk [vmem:[#allocation2 + $0x20] sm:$0xff] %vm461_vm0, %v814_v22  ;;  %vm1456_vm4 = vcmp.lt.s32.totalorder %v3449_v3, 64  ;;  %vm1719_vm5 = vcmp.lt.s32.totalorder %v3449_v3, 32 }
 0x42d   :  { %v2292_v55 = vpop.f32.mrb[22].mxu0 }
 0x42e   :  { %840 = vst.msk [vmem:[#allocation2 + $0x38] sm:$0xff] %vm461_vm0, %v2292_v55  ;;  %v824_v2 = vpop.f32.mrb[23].mxu0 }
 0x42f   :  { %839 = vst.msk [vmem:[#allocation2 + $0x30] sm:$0xff] %vm461_vm0, %v824_v2 }
 0x493   :  { %v2339_v47 = vpop.f32.mrb[24].mxu0 }
 0x494   :  { %v1220_v49 = vpop.f32.mrb[25].mxu0 }
 0x495   :  { %1267 = vrot.lane.b32.xlu1 %v1220_v49, %s2784_s25 }
 0x497   :  { %v2342_v63 = vpop.f32.mrb[26].mxu0 }
 0x498   :  { %v1230_v42 = vpop.f32.mrb[27].mxu0 }
 0x499   :  { %1269 = vrot.lane.b32.xlu1 %v2339_v47, %s2784_s25  ;;  %1271 = vrot.lane.b32.xlu0 %v1230_v42, %s2784_s25 }
 0x49b   :  { %v2345_v56 = vpop.f32.mrb[28].mxu0 }
 0x49c   :  { %v1240_v59 = vpop.f32.mrb[29].mxu0 }
 0x49d   :  { %1273 = vrot.lane.b32.xlu1 %v2342_v63, %s2784_s25  ;;  %1275 = vrot.lane.b32.xlu0 %v1240_v59, %s2784_s25 }
 0x49f   :  { %v2348_v44 = vpop.f32.mrb[30].mxu0 }
 0x4a0   :  { %v1250_v28 = vpop.f32.mrb[31].mxu0 }
 0x4a1   :  { %1277 = vrot.lane.b32.xlu1 %v2345_v56, %s2784_s25  ;;  %1279 = vrot.lane.b32.xlu0 %v1250_v28, %s2784_s25 }
 0x4a5   :  { %1281 = vrot.lane.b32.xlu1 %v2348_v44, %s2784_s25 }
 0x507   :  { %v1268_v1 = vpop.permute.xlu1 %1267 }
 0x508   :  { %1292 = vst.msk [vmem:[#allocation2] sm:$0xff] %vm1291_vm3, %v1268_v1 }
 0x50b   :  { %v1270_v5 = vpop.permute.xlu1 %1269  ;;  %v1272_v48 = vpop.permute.xlu0 %1271 }
 0x50c   :  { %1293 = vst.msk [vmem:[#allocation2 + $0x8] sm:$0xff] %vm1291_vm3, %v1270_v5  ;;  %1294 = vst.msk [vmem:[#allocation2 + $0x10] sm:$0xff] %vm1291_vm3, %v1272_v48 }
 0x50f   :  { %v1274_v24 = vpop.permute.xlu1 %1273  ;;  %v1276_v33 = vpop.permute.xlu0 %1275  ;;  %v1300_v25 = vld [vmem:[#allocation2] sm:$0xff] }
 0x510   :  { %1295 = vst.msk [vmem:[#allocation2 + $0x18] sm:$0xff] %vm1291_vm3, %v1274_v24  ;;  %1296 = vst.msk [vmem:[#allocation2 + $0x20] sm:$0xff] %vm1291_vm3, %v1276_v33  ;;  %2365 = vmatprep.mubr.msk.f32.mxu0 %vm615_vm2, %v1300_v25 }
 0x513   :  { %v1278_v26 = vpop.permute.xlu1 %1277  ;;  %v1280_v27 = vpop.permute.xlu0 %1279  ;;  %v1301_v62 = vld [vmem:[#allocation2 + $0x8] sm:$0xff]  ;;  %v1302_v0 = vld [vmem:[#allocation2 + $0x10] sm:$0xff] }
 0x514   :  { %1297 = vst.msk [vmem:[#allocation2 + $0x28] sm:$0xff] %vm1291_vm3, %v1278_v26  ;;  %1298 = vst.msk [vmem:[#allocation2 + $0x30] sm:$0xff] %vm1291_vm3, %v1280_v27  ;;  %2366 = vmatmul.mubr.msk.f32.vlgmr.msra.gmra.mrb[32].mxu0 %vm615_vm2, %v1301_v62 }
 0x515   :  { %2368 = vmatprep.mubr.msk.f32.mxu0 %vm615_vm2, %v1302_v0 }
 0x517   :  { %v1282_v7 = vpop.permute.xlu1 %1281  ;;  %v1303_v37 = vld [vmem:[#allocation2 + $0x18] sm:$0xff]  ;;  %v1304_v29 = vld [vmem:[#allocation2 + $0x20] sm:$0xff] }
 0x518   :  { %1299 = vst.msk [vmem:[#allocation2 + $0x38] sm:$0xff] %vm1291_vm3, %v1282_v7  ;;  %2369 = vmatmul.mubr.msk.f32.gmra.mrb[34].mxu0 %vm615_vm2, %v1303_v37 }
 0x519   :  { %2371 = vmatprep.mubr.msk.f32.mxu0 %vm615_vm2, %v1304_v29 }
 0x51b   :  { %v1305_v30 = vld [vmem:[#allocation2 + $0x28] sm:$0xff]  ;;  %v1306_v31 = vld [vmem:[#allocation2 + $0x30] sm:$0xff] }
 0x51c   :  { %2372 = vmatmul.mubr.msk.f32.gmra.mrb[36].mxu0 %vm615_vm2, %v1305_v30 }
 0x51d   :  { %2374 = vmatprep.mubr.msk.f32.mxu0 %vm615_vm2, %v1306_v31 }
 0x51f   :  { %v1307_v4 = vld [vmem:[#allocation2 + $0x38] sm:$0xff] }
 0x520   :  { %2375 = vmatmul.mubr.msk.f32.gmra.mrb[38].mxu0 %vm615_vm2, %v1307_v4  ;;  %v1593_v4 = vld [vmem:[%s3634_s12 + $0x20] sm:$0xff] }
 0x5e7   :  { %v2367_v6 = vpop.f32.mrb[32].mxu0 }
 0x5e8   :  { %v1419_v14 = vadd.f32 %v2367_v6, %v1915_v32  ;;  %v1413_v10 = vpop.f32.mrb[33].mxu0 }
 0x5e9   :  { %v1414_v36 = vadd.f32 %v1915_v32, %v1413_v10 }
 0x5ea   :  { %1459 = vadd.xlane.f32.xlu1 %v1419_v14 }
 0x5eb   :  { %v2370_v35 = vpop.f32.mrb[34].mxu0  ;;  %1457 = vadd.xlane.f32.xlu0 %v1414_v36 }
 0x5ec   :  { %v1423_v11 = vpop.f32.mrb[35].mxu0  ;;  %v1429_v41 = vadd.f32 %v2370_v35, %v1915_v32  ;;  %v1596_v35 = vld [vmem:[%s3634_s12 + $0x38] sm:$0xff] }
 0x5ed   :  { %v1424_v38 = vadd.f32 %v1915_v32, %v1423_v11 }
 0x5ef   :  { %v2373_v15 = vpop.f32.mrb[36].mxu0  ;;  %1461 = vadd.xlane.f32.xlu0 %v1424_v38 }
 0x5f0   :  { %v1433_v39 = vpop.f32.mrb[37].mxu0  ;;  %v1439_v57 = vadd.f32 %v2373_v15, %v1915_v32  ;;  %v1598_v15 = vld [vmem:[%s3634_s12 + $0x48] sm:$0xff] }
 0x5f1   :  { %v1434_v43 = vadd.f32 %v1915_v32, %v1433_v39 }
 0x5f3   :  { %v2376_v45 = vpop.f32.mrb[38].mxu0  ;;  %1465 = vadd.xlane.f32.xlu1 %v1434_v43  ;;  %1463 = vadd.xlane.f32.xlu0 %v1429_v41 }
 0x5f4   :  { %v1443_v53 = vpop.f32.mrb[39].mxu0  ;;  %v1449_v34 = vadd.f32 %v2376_v45, %v1915_v32 }
 0x5f5   :  { %v1444_v61 = vadd.f32 %v1915_v32, %v1443_v53  ;;  %v1594_v32 = vld [vmem:[%s3634_s12 + $0x28] sm:$0xff]  ;;  %v1601_v53 = vld [vmem:[%s3634_s12 + $0x60] sm:$0xff] }
 0x5f7   :  { %1469 = vadd.xlane.f32.xlu1 %v1444_v61  ;;  %1467 = vadd.xlane.f32.xlu0 %v1439_v57 }
 0x5fb   :  { %1471 = vadd.xlane.f32.xlu0 %v1449_v34 }
 0x677   :  { %v1460_v58 = vpop.xlane.xlu1 %1459 }
 0x678   :  { %v1474_v20 = vmul.f32 0.015625, %v1460_v58  ;;  %v1458_v21 = vpop.xlane.xlu0 %1457 }
 0x679   :  { %v1473_v22 = vmul.f32 0.015625, %v1458_v21 }
 0x67a   :  { %v3452_v55 = vsub.f32 %v1419_v14, %v1474_v20  ;;  %v2621_v14 = vpack.c.bf16 %v1594_v32, %v1593_v4 }
 0x67b   :  { %v3454_v2 = vsub.f32 %v1414_v36, %v1473_v22  ;;  %v1595_v36 = vld [vmem:[%s3634_s12 + $0x30] sm:$0xff] }
 0x67c   :  { %v1462_v8 = vpop.xlane.xlu0 %1461  ;;  %v1490_v13 = vsel %vm1456_vm4, %v3452_v55, 0.0  ;;  %2622 = vmatprep.subr.bf16.mxu1 %v2621_v14  ;;  %v2625_v11 = vpack.c.bf16 %v1596_v35, %v1595_v36 }
 0x67d   :  { %v1475_v18 = vmul.f32 0.015625, %v1462_v8  ;;  %v1498_v50 = vmul.f32 %v1490_v13, %v1490_v13  ;;  %v1489_v52 = vsel %vm1456_vm4, %v3454_v2, 0.0  ;;  %2624 = vmatpush3.bf16.msra.mxu1 %v2621_v14 }
 0x67e   :  { %v1497_v60 = vmul.f32 %v1489_v52, %v1489_v52  ;;  %2626 = vmatprep.subr.bf16.mxu1 %v2625_v11 }
 0x67f   :  { %v3462_v19 = vsub.f32 %v1424_v38, %v1475_v18  ;;  %1507 = vadd.xlane.f32.xlu0 %v1498_v50  ;;  %v1597_v38 = vld [vmem:[%s3634_s12 + $0x40] sm:$0xff] }
 0x680   :  { %v1466_v54 = vpop.xlane.xlu1 %1465  ;;  %1505 = vadd.xlane.f32.xlu1 %v1497_v60  ;;  %v1464_v23 = vpop.xlane.xlu0 %1463  ;;  %v2629_v39 = vpack.c.bf16 %v1598_v15, %v1597_v38 }
 0x681   :  { %v1477_v47 = vmul.f32 0.015625, %v1466_v54  ;;  %v1476_v49 = vmul.f32 0.015625, %v1464_v23  ;;  %v1491_v63 = vsel %vm1456_vm4, %v3462_v19, 0.0  ;;  %2628 = vmatpush3.bf16.msra.mxu1 %v2625_v11 }
 0x682   :  { %v1499_v42 = vmul.f32 %v1491_v63, %v1491_v63  ;;  %2630 = vmatprep.subr.bf16.mxu1 %v2629_v39 }
 0x683   :  { %v3467_v56 = vsub.f32 %v1434_v43, %v1477_v47  ;;  %v3469_v59 = vsub.f32 %v1429_v41, %v1476_v49  ;;  %v1599_v41 = vld [vmem:[%s3634_s12 + $0x50] sm:$0xff]  ;;  %v1600_v43 = vld [vmem:[%s3634_s12 + $0x58] sm:$0xff] }
 0x684   :  { %v1470_v44 = vpop.xlane.xlu1 %1469  ;;  %1509 = vadd.xlane.f32.xlu1 %v1499_v42  ;;  %v1468_v28 = vpop.xlane.xlu0 %1467  ;;  %v2633_v45 = vpack.c.bf16 %v1600_v43, %v1599_v41  ;;  %v1924_v42 = vld [vmem:[%s3635_s10] ss:$0 sm:$0xff] }
 0x685   :  { %v1479_v1 = vmul.f32 0.015625, %v1470_v44  ;;  %v1478_v5 = vmul.f32 0.015625, %v1468_v28  ;;  %v1493_v48 = vsel %vm1456_vm4, %v3467_v56, 0.0  ;;  %v1492_v24 = vsel %vm1456_vm4, %v3469_v59, 0.0  ;;  %2632 = vmatpush3.bf16.msra.mxu1 %v2629_v39 }
 0x686   :  { %v1501_v33 = vmul.f32 %v1493_v48, %v1493_v48  ;;  %v1500_v25 = vmul.f32 %v1492_v24, %v1492_v24  ;;  %2634 = vmatprep.subr.bf16.mxu1 %v2633_v45  ;;  %v1925_v24 = vld [vmem:[%s3636_s11] ss:$0 sm:$0xff] }
 0x687   :  { %v3477_v26 = vsub.f32 %v1444_v61, %v1479_v1  ;;  %v3479_v27 = vsub.f32 %v1439_v57, %v1478_v5  ;;  %v1602_v57 = vld [vmem:[%s3634_s12 + $0x68] sm:$0xff] }
 0x688   :  { %1513 = vadd.xlane.f32.xlu1 %v1501_v33  ;;  %1511 = vadd.xlane.f32.xlu0 %v1500_v25  ;;  %v1472_v62 = vpop.xlane.xlu0 %1471  ;;  %v2637_v61 = vpack.c.bf16 %v1602_v57, %v1601_v53 }
 0x689   :  { %v1480_v0 = vmul.f32 0.015625, %v1472_v62  ;;  %v1495_v7 = vsel %vm1456_vm4, %v3477_v26, 0.0  ;;  %v1494_v37 = vsel %vm1456_vm4, %v3479_v27, 0.0  ;;  %2636 = vmatpush3.bf16.msra.mxu1 %v2633_v45 }
 0x68a   :  { %v1503_v29 = vmul.f32 %v1495_v7, %v1495_v7  ;;  %v1502_v30 = vmul.f32 %v1494_v37, %v1494_v37  ;;  %2638 = vmatprep.subr.bf16.mxu1 %v2637_v61 }
 0x68b   :  { %v3487_v31 = vsub.f32 %v1449_v34, %v1480_v0  ;;  %v1603_v34 = vld [vmem:[%s3634_s12 + $0x70] sm:$0xff] }
 0x68c   :  { %1517 = vadd.xlane.f32.xlu1 %v1503_v29  ;;  %1515 = vadd.xlane.f32.xlu0 %v1502_v30  ;;  %v2641_v16 = vpack.c.bf16 %v1604_v12, %v1603_v34 }
 0x68d   :  { %v1496_v6 = vsel %vm1456_vm4, %v3487_v31, 0.0  ;;  %2640 = vmatpush3.bf16.msra.mxu1 %v2637_v61 }
 0x68e   :  { %v1504_v10 = vmul.f32 %v1496_v6, %v1496_v6  ;;  %2642 = vmatprep.subr.bf16.mxu1 %v2641_v16 }
 0x690   :  { %1519 = vadd.xlane.f32.xlu0 %v1504_v10 }
 0x691   :  { %2644 = vmatpush3.bf16.msra.mxu1 %v2641_v16 }
 0x70c   :  { %v1508_v17 = vpop.xlane.xlu0 %1507 }
 0x70d   :  { %v1522_v40 = vmul.f32 0.015625, %v1508_v17  ;;  %v1506_v51 = vpop.xlane.xlu1 %1505 }
 0x70e   :  { %v1521_v9 = vmul.f32 0.015625, %v1506_v51 }
 0x70f   :  { %v1530_v46 = vadd.f32 1e-05, %v1522_v40 }
 0x710   :  { %v1529_v58 = vadd.f32 1e-05, %v1521_v9 }
 0x711   :  { %2751 = vrsqrt.f32 %v1530_v46  ;;  %v1510_v20 = vpop.xlane.xlu1 %1509 }
 0x712   :  { %2753 = vrsqrt.f32 %v1529_v58  ;;  %v1523_v21 = vmul.f32 0.015625, %v1510_v20 }
 0x714   :  { %v1531_v22 = vadd.f32 1e-05, %v1523_v21 }
 0x715   :  { %v1514_v8 = vpop.xlane.xlu1 %1513  ;;  %v1512_v13 = vpop.xlane.xlu0 %1511 }
 0x716   :  { %2755 = vrsqrt.f32 %v1531_v22  ;;  %v1525_v18 = vmul.f32 0.015625, %v1514_v8  ;;  %v1524_v50 = vmul.f32 0.015625, %v1512_v13 }
 0x718   :  { %v1533_v52 = vadd.f32 1e-05, %v1525_v18  ;;  %v1532_v60 = vadd.f32 1e-05, %v1524_v50 }
 0x719   :  { %v1518_v54 = vpop.xlane.xlu1 %1517  ;;  %v1516_v23 = vpop.xlane.xlu0 %1515 }
 0x71a   :  { %2757 = vrsqrt.f32 %v1533_v52  ;;  %v1527_v47 = vmul.f32 0.015625, %v1518_v54  ;;  %v1526_v49 = vmul.f32 0.015625, %v1516_v23 }
 0x71b   :  { %v2752_v63 = vpop.eup %2751  ;;  %2759 = vrsqrt.f32 %v1532_v60 }
 0x71c   :  { %v2754_v44 = vpop.eup %2753  ;;  %v1546_v28 = vmul.f32 %v2752_v63, %v3452_v55  ;;  %v1535_v1 = vadd.f32 1e-05, %v1527_v47  ;;  %v1534_v5 = vadd.f32 1e-05, %v1526_v49 }
 0x71d   :  { %v1520_v48 = vpop.xlane.xlu0 %1519  ;;  %v1545_v33 = vmul.f32 %v2754_v44, %v3454_v2 }
 0x71e   :  { %2761 = vrsqrt.f32 %v1535_v1  ;;  %v1528_v25 = vmul.f32 0.015625, %v1520_v48  ;;  %v1560_v62 = vmul.f32 %v1924_v42, %v1546_v28 }
 0x71f   :  { %2763 = vrsqrt.f32 %v1534_v5  ;;  %v1559_v0 = vmul.f32 %v1924_v42, %v1545_v33 }
 0x720   :  { %v2756_v7 = vpop.eup %2755  ;;  %v1536_v37 = vadd.f32 1e-05, %v1528_v25  ;;  %v1574_v29 = vadd.f32 %v1925_v24, %v1560_v62 }
 0x721   :  { %v1573_v30 = vadd.f32 %v1925_v24, %v1559_v0  ;;  %v1547_v55 = vmul.f32 %v2756_v7, %v3462_v19 }
 0x722   :  { %2765 = vrsqrt.f32 %v1536_v37  ;;  %v1582_v14 = vmax.f32 %v1574_v29, 0.0 }
 0x723   :  { %v1581_v4 = vmax.f32 %v1573_v30, 0.0  ;;  %v1561_v32 = vmul.f32 %v1924_v42, %v1547_v55 }
 0x724   :  { %v2758_v6 = vpop.eup %2757 }
 0x725   :  { %v2760_v10 = vpop.eup %2759  ;;  %2409 = vmatprep.mubr.f32.mxu1 %v1581_v4  ;;  %v1575_v36 = vadd.f32 %v1925_v24, %v1561_v32  ;;  %v1549_v2 = vmul.f32 %v2758_v6, %v3467_v56 }
 0x726   :  { %2410 = vmatmul.mubr.f32.vlgmr.msra.gmra.mrb[24].mxu1 %v1582_v14  ;;  %v1548_v35 = vmul.f32 %v2760_v10, %v3469_v59 }
 0x727   :  { %v1583_v11 = vmax.f32 %v1575_v36, 0.0  ;;  %v1563_v38 = vmul.f32 %v1924_v42, %v1549_v2 }
 0x728   :  { %v2762_v15 = vpop.eup %2761  ;;  %v1562_v39 = vmul.f32 %v1924_v42, %v1548_v35 }
 0x729   :  { %v2764_v41 = vpop.eup %2763  ;;  %2412 = vmatprep.mubr.f32.mxu1 %v1583_v11  ;;  %v1577_v19 = vadd.f32 %v1925_v24, %v1563_v38  ;;  %v1551_v43 = vmul.f32 %v2762_v15, %v3477_v26 }
 0x72a   :  { %v1576_v45 = vadd.f32 %v1925_v24, %v1562_v39  ;;  %v1550_v53 = vmul.f32 %v2764_v41, %v3479_v27  ;;  %v1926_v27 = vld [vmem:[%s3637_s13] ss:$0 sm:$0xff] }
 0x72b   :  { %v1585_v57 = vmax.f32 %v1577_v19, 0.0  ;;  %v1565_v61 = vmul.f32 %v1924_v42, %v1551_v43 }
 0x72c   :  { %v2766_v34 = vpop.eup %2765  ;;  %v1584_v12 = vmax.f32 %v1576_v45, 0.0  ;;  %v1564_v56 = vmul.f32 %v1924_v42, %v1550_v53 }
 0x72d   :  { %v1579_v16 = vadd.f32 %v1925_v24, %v1565_v61  ;;  %v1552_v59 = vmul.f32 %v2766_v34, %v3487_v31 }
 0x72e   :  { %2413 = vmatmul.mubr.f32.gmra.mrb[26].mxu1 %v1584_v12  ;;  %v1578_v17 = vadd.f32 %v1925_v24, %v1564_v56 }
 0x72f   :  { %2415 = vmatprep.mubr.f32.mxu1 %v1585_v57  ;;  %v1587_v40 = vmax.f32 %v1579_v16, 0.0  ;;  %v1566_v51 = vmul.f32 %v1924_v42, %v1552_v59 }
 0x730   :  { %v1586_v9 = vmax.f32 %v1578_v17, 0.0 }
 0x731   :  { %v1580_v46 = vadd.f32 %v1925_v24, %v1566_v51 }
 0x732   :  { %2416 = vmatmul.mubr.f32.gmra.mrb[28].mxu1 %v1586_v9 }
 0x733   :  { %2418 = vmatprep.mubr.f32.mxu1 %v1587_v40  ;;  %v1588_v26 = vmax.f32 %v1580_v46, 0.0 }
 0x736   :  { %2419 = vmatmul.mubr.f32.gmra.mrb[30].mxu1 %v1588_v26 }
 0x7f9   :  { %v2411_v58 = vpop.f32.mrb[24].mxu1 }
 0x7fa   :  { %v1684_v20 = vadd.f32 %v2411_v58, %v1926_v27  ;;  %v1678_v21 = vpop.f32.mrb[25].mxu1 }
 0x7fb   :  { %v1679_v22 = vadd.f32 %v1926_v27, %v1678_v21 }
 0x7fc   :  { %1722 = vadd.xlane.f32.xlu0 %v1684_v20 }
 0x7fd   :  { %1720 = vadd.xlane.f32.xlu1 %v1679_v22 }
 0x801   :  { %v2414_v31 = vpop.f32.mrb[26].mxu1 }
 0x802   :  { %v1694_v8 = vadd.f32 %v2414_v31, %v1926_v27  ;;  %v1688_v13 = vpop.f32.mrb[27].mxu1 }
 0x803   :  { %v1689_v18 = vadd.f32 %v1926_v27, %v1688_v13 }
 0x804   :  { %1726 = vadd.xlane.f32.xlu0 %v1694_v8 }
 0x805   :  { %1724 = vadd.xlane.f32.xlu1 %v1689_v18  ;;  %v2417_v50 = vpop.f32.mrb[28].mxu1 }
 0x806   :  { %v1704_v52 = vadd.f32 %v2417_v50, %v1926_v27  ;;  %v1698_v60 = vpop.f32.mrb[29].mxu1 }
 0x807   :  { %v1699_v54 = vadd.f32 %v1926_v27, %v1698_v60 }
 0x808   :  { %1730 = vadd.xlane.f32.xlu0 %v1704_v52 }
 0x809   :  { %1728 = vadd.xlane.f32.xlu1 %v1699_v54  ;;  %v2420_v23 = vpop.f32.mrb[30].mxu1 }
 0x80a   :  { %v1714_v47 = vadd.f32 %v2420_v23, %v1926_v27  ;;  %v1708_v49 = vpop.f32.mrb[31].mxu1 }
 0x80b   :  { %v1709_v63 = vadd.f32 %v1926_v27, %v1708_v49 }
 0x80c   :  { %1734 = vadd.xlane.f32.xlu0 %v1714_v47 }
 0x80d   :  { %1732 = vadd.xlane.f32.xlu1 %v1709_v63 }
 0x889   :  { %v1723_v42 = vpop.xlane.xlu0 %1722 }
 0x88a   :  { %v1737_v44 = vmul.f32 0.03125, %v1723_v42  ;;  %v1721_v28 = vpop.xlane.xlu1 %1720 }
 0x88b   :  { %v1736_v1 = vmul.f32 0.03125, %v1721_v28 }
 0x88c   :  { %v3546_v5 = vsub.f32 %v1684_v20, %v1737_v44 }
 0x88d   :  { %v3548_v48 = vsub.f32 %v1679_v22, %v1736_v1 }
 0x88e   :  { %v1753_v24 = vsel %vm1719_vm5, %v3546_v5, 0.0 }
 0x88f   :  { %v1761_v33 = vmul.f32 %v1753_v24, %v1753_v24  ;;  %v1752_v25 = vsel %vm1719_vm5, %v3548_v48, 0.0 }
 0x890   :  { %v1760_v62 = vmul.f32 %v1752_v25, %v1752_v25 }
 0x891   :  { %v1727_v0 = vpop.xlane.xlu0 %1726  ;;  %1770 = vadd.xlane.f32.xlu0 %v1761_v33 }
 0x892   :  { %v1739_v7 = vmul.f32 0.03125, %v1727_v0  ;;  %v1725_v37 = vpop.xlane.xlu1 %1724  ;;  %1768 = vadd.xlane.f32.xlu1 %v1760_v62 }
 0x893   :  { %v1738_v29 = vmul.f32 0.03125, %v1725_v37 }
 0x894   :  { %v3556_v30 = vsub.f32 %v1694_v8, %v1739_v7 }
 0x895   :  { %v3558_v55 = vsub.f32 %v1689_v18, %v1738_v29  ;;  %v1731_v4 = vpop.xlane.xlu0 %1730 }
 0x896   :  { %v1741_v32 = vmul.f32 0.03125, %v1731_v4  ;;  %v1729_v6 = vpop.xlane.xlu1 %1728  ;;  %v1755_v14 = vsel %vm1719_vm5, %v3556_v30, 0.0 }
 0x897   :  { %v1740_v10 = vmul.f32 0.03125, %v1729_v6  ;;  %v1763_v36 = vmul.f32 %v1755_v14, %v1755_v14  ;;  %v1754_v2 = vsel %vm1719_vm5, %v3558_v55, 0.0 }
 0x898   :  { %v3566_v35 = vsub.f32 %v1704_v52, %v1741_v32  ;;  %v1762_v11 = vmul.f32 %v1754_v2, %v1754_v2  ;;  %v1927_v52 = vld [vmem:[%s3638_s14] ss:$0 sm:$0xff] }
 0x899   :  { %v3568_v38 = vsub.f32 %v1699_v54, %v1740_v10  ;;  %1774 = vadd.xlane.f32.xlu0 %v1763_v36  ;;  %v1735_v15 = vpop.xlane.xlu0 %1734 }
 0x89a   :  { %v1743_v39 = vmul.f32 0.03125, %v1735_v15  ;;  %1772 = vadd.xlane.f32.xlu1 %v1762_v11  ;;  %v1733_v41 = vpop.xlane.xlu1 %1732  ;;  %v1757_v19 = vsel %vm1719_vm5, %v3566_v35, 0.0 }
 0x89b   :  { %v1742_v43 = vmul.f32 0.03125, %v1733_v41  ;;  %v1765_v45 = vmul.f32 %v1757_v19, %v1757_v19  ;;  %v1756_v53 = vsel %vm1719_vm5, %v3568_v38, 0.0 }
 0x89c   :  { %v3576_v57 = vsub.f32 %v1714_v47, %v1743_v39  ;;  %v1764_v61 = vmul.f32 %v1756_v53, %v1756_v53 }
 0x89d   :  { %v3578_v34 = vsub.f32 %v1709_v63, %v1742_v43  ;;  %1778 = vadd.xlane.f32.xlu0 %v1765_v45  ;;  %v1928_v63 = vld [vmem:[%s3639_s15] ss:$0 sm:$0xff] }
 0x89e   :  { %1776 = vadd.xlane.f32.xlu1 %v1764_v61  ;;  %v1759_v12 = vsel %vm1719_vm5, %v3576_v57, 0.0 }
 0x89f   :  { %v1767_v56 = vmul.f32 %v1759_v12, %v1759_v12  ;;  %v1758_v16 = vsel %vm1719_vm5, %v3578_v34, 0.0 }
 0x8a0   :  { %v1766_v59 = vmul.f32 %v1758_v16, %v1758_v16 }
 0x8a1   :  { %1782 = vadd.xlane.f32.xlu0 %v1767_v56 }
 0x8a2   :  { %1780 = vadd.xlane.f32.xlu1 %v1766_v59 }
 0x91e   :  { %v1771_v17 = vpop.xlane.xlu0 %1770 }
 0x91f   :  { %v1785_v40 = vmul.f32 0.03125, %v1771_v17  ;;  %v1769_v51 = vpop.xlane.xlu1 %1768 }
 0x920   :  { %v1784_v9 = vmul.f32 0.03125, %v1769_v51 }
 0x921   :  { %v1793_v46 = vadd.f32 1e-05, %v1785_v40 }
 0x922   :  { %v1792_v26 = vadd.f32 1e-05, %v1784_v9 }
 0x923   :  { %2767 = vrsqrt.f32 %v1793_v46 }
 0x924   :  { %2769 = vrsqrt.f32 %v1792_v26 }
 0x926   :  { %v1775_v27 = vpop.xlane.xlu0 %1774 }
 0x927   :  { %v1787_v58 = vmul.f32 0.03125, %v1775_v27  ;;  %v1773_v20 = vpop.xlane.xlu1 %1772 }
 0x928   :  { %v1786_v21 = vmul.f32 0.03125, %v1773_v20 }
 0x929   :  { %v1795_v22 = vadd.f32 1e-05, %v1787_v58 }
 0x92a   :  { %v1794_v31 = vadd.f32 1e-05, %v1786_v21  ;;  %v1779_v8 = vpop.xlane.xlu0 %1778 }
 0x92b   :  { %2771 = vrsqrt.f32 %v1795_v22  ;;  %v1789_v3 = vmul.f32 0.03125, %v1779_v8  ;;  %v1777_v13 = vpop.xlane.xlu1 %1776 }
 0x92c   :  { %2773 = vrsqrt.f32 %v1794_v31  ;;  %v1788_v18 = vmul.f32 0.03125, %v1777_v13 }
 0x92d   :  { %v2768_v50 = vpop.eup %2767  ;;  %v1797_v60 = vadd.f32 1e-05, %v1789_v3 }
 0x92e   :  { %v2770_v54 = vpop.eup %2769  ;;  %v1809_v23 = vmul.f32 %v2768_v50, %v3546_v5  ;;  %v1796_v47 = vadd.f32 1e-05, %v1788_v18  ;;  %v1783_v49 = vpop.xlane.xlu0 %1782 }
 0x92f   :  { %v1808_v42 = vmul.f32 %v2770_v54, %v3548_v48  ;;  %2775 = vrsqrt.f32 %v1797_v60  ;;  %v1791_v44 = vmul.f32 0.03125, %v1783_v49  ;;  %v1781_v28 = vpop.xlane.xlu1 %1780 }
 0x930   :  { %v1823_v1 = vmul.f32 %v1927_v52, %v1809_v23  ;;  %2777 = vrsqrt.f32 %v1796_v47  ;;  %v1790_v24 = vmul.f32 0.03125, %v1781_v28 }
 0x931   :  { %v1822_v33 = vmul.f32 %v1927_v52, %v1808_v42  ;;  %v1799_v25 = vadd.f32 1e-05, %v1791_v44 }
 0x932   :  { %v1837_v62 = vadd.f32 %v1928_v63, %v1823_v1  ;;  %v1798_v0 = vadd.f32 1e-05, %v1790_v24 }
 0x933   :  { %v1836_v7 = vadd.f32 %v1928_v63, %v1822_v33  ;;  %2779 = vrsqrt.f32 %v1799_v25 }
 0x934   :  { %v1845_v5 = vmax.f32 %v1837_v62, 0.0  ;;  %2781 = vrsqrt.f32 %v1798_v0 }
 0x935   :  { %v2772_v37 = vpop.eup %2771  ;;  %v1844_v29 = vmax.f32 %v1836_v7, 0.0 }
 0x936   :  { %v2774_v4 = vpop.eup %2773  ;;  %1853 = vst [vmem:[%s3640_s16 + $0x8] sm:$0xff] %v1845_v5  ;;  %v1811_v48 = vmul.f32 %v2772_v37, %v3556_v30 }
 0x937   :  { %1852 = vst [vmem:[%s3640_s16] sm:$0xff] %v1844_v29  ;;  %v1810_v32 = vmul.f32 %v2774_v4, %v3558_v55 }
 0x938   :  { %v1825_v6 = vmul.f32 %v1927_v52, %v1811_v48 }
 0x939   :  { %v2776_v14 = vpop.eup %2775  ;;  %v1824_v10 = vmul.f32 %v1927_v52, %v1810_v32 }
 0x93a   :  { %v2778_v36 = vpop.eup %2777  ;;  %v1839_v2 = vadd.f32 %v1928_v63, %v1825_v6  ;;  %v1813_v11 = vmul.f32 %v2776_v14, %v3566_v35 }
 0x93b   :  { %v1838_v15 = vadd.f32 %v1928_v63, %v1824_v10  ;;  %v1812_v39 = vmul.f32 %v2778_v36, %v3568_v38 }
 0x93c   :  { %v1847_v41 = vmax.f32 %v1839_v2, 0.0  ;;  %v1827_v19 = vmul.f32 %v1927_v52, %v1813_v11 }
 0x93d   :  { %v2780_v43 = vpop.eup %2779  ;;  %v1846_v30 = vmax.f32 %v1838_v15, 0.0  ;;  %v1826_v45 = vmul.f32 %v1927_v52, %v1812_v39 }
 0x93e   :  { %v2782_v53 = vpop.eup %2781  ;;  %1855 = vst [vmem:[%s3640_s16 + $0x18] sm:$0xff] %v1847_v41  ;;  %v1841_v55 = vadd.f32 %v1928_v63, %v1827_v19  ;;  %v1815_v61 = vmul.f32 %v2780_v43, %v3576_v57 }
 0x93f   :  { %1854 = vst [vmem:[%s3640_s16 + $0x10] sm:$0xff] %v1846_v30  ;;  %v1840_v35 = vadd.f32 %v1928_v63, %v1826_v45  ;;  %v1814_v38 = vmul.f32 %v2782_v53, %v3578_v34 }
 0x940   :  { %v1849_v12 = vmax.f32 %v1841_v55, 0.0  ;;  %v1829_v56 = vmul.f32 %v1927_v52, %v1815_v61 }
 0x941   :  { %v1848_v16 = vmax.f32 %v1840_v35, 0.0  ;;  %v1828_v59 = vmul.f32 %v1927_v52, %v1814_v38 }
 0x942   :  { %1857 = vst [vmem:[%s3640_s16 + $0x28] sm:$0xff] %v1849_v12  ;;  %v1843_v17 = vadd.f32 %v1928_v63, %v1829_v56 }
 0x943   :  { %1856 = vst [vmem:[%s3640_s16 + $0x20] sm:$0xff] %v1848_v16  ;;  %v1842_v57 = vadd.f32 %v1928_v63, %v1828_v59 }
 0x944   :  { %v1851_v40 = vmax.f32 %v1843_v17, 0.0 }
 0x945   :  { %v1850_v51 = vmax.f32 %v1842_v57, 0.0 }
 0x946   :  { %1859 = vst [vmem:[%s3640_s16 + $0x38] sm:$0xff] %v1851_v40 }
 0x947   :  { %1858 = vst [vmem:[%s3640_s16 + $0x30] sm:$0xff] %v1850_v51 }

</bundles_post_ra>
